<compile_context>
chip_gen: v7x
topology: tpu7x:2x2x1
jax: 0.10.0
libtpu: 0.0.40
codegen_flags: <defaults>
</compile_context>

<pallas_src>
import math
import functools

import jax
import jax.numpy as jnp
from jax import lax
from jax.experimental import pallas as pl
from jax.experimental.pallas import tpu as pltpu


VMEM_SPEC = pl.BlockSpec(memory_space=pltpu.MemorySpace.VMEM)
OUT_LANES = 128  # lane-dense output slab width (and packed-param row width)


# ---------------------------------------------------------------------------
# Fused Pallas kernel: encoder (convs + fc + LayerNorm) + trunk + actor head
# ---------------------------------------------------------------------------
def _actor_fused_kernel(*refs, B, F, A, h_outs, w_outs,
                        log_std_min, log_std_max, ln_eps):
    f32, bf16 = jnp.float32, jnp.bfloat16
    L = len(h_outs)

    xph_ref = refs[0]                       # (4, Hp*B, Wp*C)  bf16 phase slabs
    conv_w = refs[1:1 + L]                  # per layer: (9, K_l, N_l) bf16
    (fcw_ref, tw1_ref, tw2_ref, tw3_ref,
     pvec_ref, noise_ref) = refs[1 + L:1 + L + 6]
    out_ref = refs[1 + L + 6]               # (B, 128) f32

    # ---------------- conv0: 3x3 stride 2 via 2x2 phase decomposition -------
    H1, W1 = h_outs[0], w_outs[0]
    acc = jnp.zeros((H1 * B, W1 * F), f32)
    for ki in range(3):
        ri = ki // 2                                  # row shift inside phase
        for kj in range(3):
            p = 2 * (ki % 2) + (kj % 2)               # which 2x2 phase
            xs = xph_ref[p, ri * B:(ri + H1) * B, :]  # contiguous rows, full lanes
            acc = acc + jnp.dot(xs, conv_w[0][ki * 3 + kj],
                                preferred_element_type=f32)
    h = jnp.maximum(acc + pvec_ref[0:1, 0:W1 * F], 0.0).astype(bf16)

    # ---------------- conv1..L-1: 3x3 stride 1 -------------------------------
    for l in range(1, L):
        Ho, Wo = h_outs[l], w_outs[l]
        acc = jnp.zeros((Ho * B, Wo * F), f32)
        for ki in range(3):
            xs = h[ki * B:(ki + Ho) * B, :]           # contiguous static slice
            for kj in range(3):
                acc = acc + jnp.dot(xs, conv_w[l][ki * 3 + kj],
                                    preferred_element_type=f32)
        h = jnp.maximum(acc + pvec_ref[l:l + 1, 0:Wo * F], 0.0).astype(bf16)

    # ---------------- encoder fc (per conv-row, M=B) + LayerNorm -------------
    HL = h_outs[L - 1]
    feat_dim = fcw_ref.shape[2]
    accf = jnp.zeros((B, feat_dim), f32)
    for r in range(HL):
        accf = accf + jnp.dot(h[r * B:(r + 1) * B, :], fcw_ref[r],
                              preferred_element_type=f32)
    y = accf + pvec_ref[L:L + 1, 0:feat_dim]

    mean = jnp.mean(y, axis=-1, keepdims=True)
    var = jnp.mean((y - mean) * (y - mean), axis=-1, keepdims=True)
    feat = ((y - mean) * lax.rsqrt(var + ln_eps)
            * pvec_ref[L + 1:L + 2, 0:feat_dim]
            + pvec_ref[L + 2:L + 3, 0:feat_dim])

    # ---------------- trunk MLP + merged tanh-gaussian head ------------------
    hid = tw1_ref.shape[1]
    t = jnp.dot(feat.astype(bf16), tw1_ref[...], preferred_element_type=f32)
    t = jnp.maximum(t + pvec_ref[L + 3:L + 4, 0:hid], 0.0)
    t = jnp.dot(t.astype(bf16), tw2_ref[...], preferred_element_type=f32)
    t = jnp.maximum(t + pvec_ref[L + 4:L + 5, 0:hid], 0.0)
    head = jnp.dot(t.astype(bf16), tw3_ref[...], preferred_element_type=f32)
    head = head + pvec_ref[L + 5:L + 6, 0:2 * A]      # (B, 2A)
    mu = head[:, 0:A]
    ls = head[:, A:2 * A]

    half = 0.5 * (log_std_max - log_std_min)
    log_std = (log_std_min + half) + half * jnp.tanh(ls)
    std = jnp.exp(log_std)

    noise = noise_ref[...]
    pi = mu + noise * std

    # gaussian_logprob
    log_pi = jnp.sum(-0.5 * noise * noise - log_std, axis=-1, keepdims=True)
    log_pi = log_pi - 0.5 * math.log(2.0 * math.pi) * A

    # squash
    mu_t = jnp.tanh(mu)
    pi_t = jnp.tanh(pi)
    log_pi = log_pi - jnp.sum(
        jnp.log(jnp.maximum(1.0 - pi_t * pi_t, 0.0) + 1e-6),
        axis=-1, keepdims=True)

    # ---------------- single lane-dense (B, 128) output store ----------------
    pad = jnp.zeros((B, OUT_LANES - (3 * A + 1)), f32)
    out_ref[...] = jnp.concatenate([mu_t, pi_t, log_std, log_pi, pad], axis=-1)


# ---------------------------------------------------------------------------
# Parameter construction (PyTorch-equivalent init) and kernel-layout prep
# ---------------------------------------------------------------------------
def orthogonal(key, rows, cols, gain=1.0):
    n = max(rows, cols)
    a = jax.random.normal(key, (n, n), dtype=jnp.float32)
    q, r = jnp.linalg.qr(a)
    q = q * jnp.sign(jnp.diag(r))
    return gain * q[:rows, :cols]


def make_actor_params(key, obs_shape, action_dim, hidden_dim,
                      encoder_feature_dim, num_layers, num_filters):
    """Parameters in PyTorch-style layout (matches Actor.apply(weight_init))."""
    C, H, W = obs_shape
    keys = jax.random.split(key, num_layers + 4)
    relu_gain = math.sqrt(2.0)

    params = {}
    convs = []
    in_c = C
    for i in range(num_layers):
        w = jnp.zeros((num_filters, in_c, 3, 3), dtype=jnp.float32)
        center = orthogonal(keys[i], num_filters, in_c, gain=relu_gain)
        w = w.at[:, :, 1, 1].set(center)
        b = jnp.zeros((num_filters,), dtype=jnp.float32)
        convs.append((w, b))
        in_c = num_filters
    params["convs"] = convs

    ho = (H - 3) // 2 + 1
    wo = (W - 3) // 2 + 1
    for _ in range(num_layers - 1):
        ho, wo = ho - 2, wo - 2
    flat = num_filters * ho * wo

    params["fc_w"] = orthogonal(keys[num_layers], encoder_feature_dim, flat).T
    params["fc_b"] = jnp.zeros((encoder_feature_dim,), dtype=jnp.float32)
    params["ln_g"] = jnp.ones((encoder_feature_dim,), dtype=jnp.float32)
    params["ln_b"] = jnp.zeros((encoder_feature_dim,), dtype=jnp.float32)

    params["w1"] = orthogonal(keys[num_layers + 1], hidden_dim, encoder_feature_dim).T
    params["b1"] = jnp.zeros((hidden_dim,), dtype=jnp.float32)
    params["w2"] = orthogonal(keys[num_layers + 2], hidden_dim, hidden_dim).T
    params["b2"] = jnp.zeros((hidden_dim,), dtype=jnp.float32)
    params["w3"] = orthogonal(keys[num_layers + 3], 2 * action_dim, hidden_dim).T
    params["b3"] = jnp.zeros((2 * action_dim,), dtype=jnp.float32)
    return params


def prepare_kernel_params(params, obs_shape, num_filters):
    """One-time, zero-runtime-cost transformation into kernel layout."""
    C, H, W = obs_shape
    F = num_filters
    L = len(params["convs"])

    h_outs, w_outs = [], []
    ho, wo = (H - 3) // 2 + 1, (W - 3) // 2 + 1
    h_outs.append(ho); w_outs.append(wo)
    for _ in range(L - 1):
        ho, wo = ho - 2, wo - 2
        h_outs.append(ho); w_outs.append(wo)
    Hp, Wp = H // 2, W // 2

    kp = {"h_outs": tuple(int(v) for v in h_outs),
          "w_outs": tuple(int(v) for v in w_outs)}

    # Block-diagonal tap weights with the width (kj) shift baked in, so every
    # in-kernel tap input is the full-lane slab (no lane-offset slices).
    # 1/255 pixel scaling is folded into the conv0 weights.
    conv_w = []
    for l, (w, _) in enumerate(params["convs"]):
        if l == 0:
            win, scale = Wp, 1.0 / 255.0       # stride-2 layer works on phases
        else:
            win, scale = kp["w_outs"][l - 1], 1.0
        wout = kp["w_outs"][l]
        taps = []
        for ki in range(3):
            for kj in range(3):
                joff = (kj // 2) if l == 0 else kj
                wtap = w[:, :, ki, kj].T * scale                  # (cin, F)
                sel = jnp.zeros((win, wout), jnp.float32)
                sel = sel.at[jnp.arange(wout) + joff, jnp.arange(wout)].set(1.0)
                taps.append(jnp.kron(sel, wtap))                  # (win*cin, wout*F)
        conv_w.append(jnp.stack(taps, axis=0).astype(jnp.bfloat16))
    kp["conv_w"] = conv_w

    # fc weight permuted so PyTorch's (C, H, W) flatten order matches the
    # kernel's (row = conv_row, lanes = width*channel) slab layout.
    HL, WL = kp["h_outs"][-1], kp["w_outs"][-1]
    feat = params["fc_w"].shape[1]
    fcw = params["fc_w"].reshape(F, HL, WL, feat).transpose(1, 2, 0, 3)
    kp["fcw"] = fcw.reshape(HL, WL * F, feat).astype(jnp.bfloat16)

    kp["tw1"] = params["w1"].astype(jnp.bfloat16)
    kp["tw2"] = params["w2"].astype(jnp.bfloat16)
    kp["tw3"] = params["w3"].astype(jnp.bfloat16)    # merged mu|log_std head

    # All small vectors packed into one (L+6, 128) f32 slab:
    #   rows 0..L-1: tiled conv biases; L: fc_b; L+1: ln_g; L+2: ln_b;
    #   L+3: trunk b1; L+4: trunk b2; L+5: head bias (2A wide).
    def _row(v):
        v = jnp.asarray(v, jnp.float32).reshape(-1)
        assert v.shape[0] <= OUT_LANES
        return jnp.pad(v, (0, OUT_LANES - v.shape[0]))

    rows = [_row(jnp.tile(b, kp["w_outs"][l]))
            for l, (_, b) in enumerate(params["convs"])]
    rows += [_row(params["fc_b"]), _row(params["ln_g"]), _row(params["ln_b"]),
             _row(params["b1"]), _row(params["b2"]), _row(params["b3"])]
    kp["pvec"] = jnp.stack(rows, axis=0)
    return kp


# ---------------------------------------------------------------------------
# Forward pass (single fused pallas_call)
# ---------------------------------------------------------------------------
def actor_forward(kp, obs, noise, *, num_filters, action_dim,
                  log_std_min, log_std_max):
    """obs: (B, C, H, W) float32 raw pixel observations (NCHW, like PyTorch)."""
    B, C, H, W = obs.shape
    F, A = num_filters, action_dim
    assert H % 2 == 0 and W % 2 == 0, "phase decomposition needs even H, W"
    assert 3 * A + 1 <= OUT_LANES
    h_outs, w_outs = kp["h_outs"], kp["w_outs"]
    Hp, Wp = H // 2, W // 2

    # NCHW -> 2x2 phase slabs with rows ordered (phase_row, batch) and lanes
    # (width, channel).  One cheap wrapper-side relayout of the raw obs,
    # shipped in bf16 (pixel values are exact) to halve HBM->VMEM DMA bytes.
    x = jnp.transpose(obs, (0, 2, 3, 1))                         # (B, H, W, C)
    phases = []
    for pi in (0, 1):
        for pj in (0, 1):
            xp = x[:, pi::2, pj::2, :]                           # (B, Hp, Wp, C)
            xp = jnp.transpose(xp, (1, 0, 2, 3)).reshape(Hp * B, Wp * C)
            phases.append(xp)
    xph = jnp.stack(phases, axis=0).astype(jnp.bfloat16)         # (4, Hp*B, Wp*C)

    inputs = ([xph] + list(kp["conv_w"])
              + [kp["fcw"], kp["tw1"], kp["tw2"], kp["tw3"], kp["pvec"], noise])

    out = pl.pallas_call(
        functools.partial(
            _actor_fused_kernel, B=B, F=F, A=A,
            h_outs=h_outs, w_outs=w_outs,
            log_std_min=float(log_std_min), log_std_max=float(log_std_max),
            ln_eps=1e-5),
        out_shape=jax.ShapeDtypeStruct((B, OUT_LANES), jnp.float32),
        in_specs=[VMEM_SPEC] * len(inputs),
        out_specs=VMEM_SPEC,
    )(*inputs)

    mu = out[:, 0:A]
    pi = out[:, A:2 * A]
    log_std = out[:, 2 * A:3 * A]
    log_pi = out[:, 3 * A:3 * A + 1]
    return mu, pi, log_pi, log_std


# ---------------------------------------------------------------------------
# Pure-JAX f32 reference (same bf16 weight quantization as the kernel)
# ---------------------------------------------------------------------------
def _q(w):
    return w.astype(jnp.bfloat16).astype(jnp.float32)


def ref_forward(params, obs, noise, *, action_dim, log_std_min, log_std_max):
    h = obs.astype(jnp.float32)      # raw pixels; /255 folded into conv0 weight
    for l, (w, b) in enumerate(params["convs"]):
        scale = (1.0 / 255.0) if l == 0 else 1.0
        stride = 2 if l == 0 else 1
        h = lax.conv_general_dilated(
            h, _q(w * scale), window_strides=(stride, stride), padding="VALID",
            dimension_numbers=("NCHW", "OIHW", "NCHW"))
        h = jnp.maximum(h + b.reshape(1, -1, 1, 1), 0.0)
    B = h.shape[0]
    flat = h.reshape(B, -1)
    y = flat @ _q(params["fc_w"]) + params["fc_b"]
    mean = y.mean(-1, keepdims=True)
    var = ((y - mean) ** 2).mean(-1, keepdims=True)
    feat = (y - mean) / jnp.sqrt(var + 1e-5) * params["ln_g"] + params["ln_b"]
    t = jnp.maximum(feat @ _q(params["w1"]) + params["b1"], 0.0)
    t = jnp.maximum(t @ _q(params["w2"]) + params["b2"], 0.0)
    head = t @ _q(params["w3"]) + params["b3"]
    A = action_dim
    mu, ls = head[:, :A], head[:, A:]
    log_std = log_std_min + 0.5 * (log_std_max - log_std_min) * (jnp.tanh(ls) + 1.0)
    std = jnp.exp(log_std)
    pi = mu + noise * std
    log_pi = jnp.sum(-0.5 * noise ** 2 - log_std, axis=-1, keepdims=True)
    log_pi = log_pi - 0.5 * math.log(2.0 * math.pi) * A
    mu_t, pi_t = jnp.tanh(mu), jnp.tanh(pi)
    log_pi = log_pi - jnp.sum(jnp.log(jnp.maximum(1.0 - pi_t ** 2, 0.0) + 1e-6),
                              axis=-1, keepdims=True)
    return mu_t, pi_t, log_pi, log_std


# ---------------------------------------------------------------------------
# Main
# ---------------------------------------------------------------------------
if __name__ == "__main__":
    # small, forward-consistent config
    obs_shape = (4, 16, 16)          # (C, H, W)
    action_dim = 4
    hidden_dim = 32
    encoder_feature_dim = 32
    num_layers = 2
    num_filters = 8
    log_std_min, log_std_max = -10.0, 2.0
    batch = 2

    key = jax.random.PRNGKey(0)
    k_param, k_perturb, k_obs, k_noise = jax.random.split(key, 4)

    params = make_actor_params(k_param, obs_shape, action_dim, hidden_dim,
                               encoder_feature_dim, num_layers, num_filters)

    # weight_init zeroes all non-center conv taps; perturb them slightly so
    # the numerical self-check below exercises the full 3x3 tap routing.
    pk = jax.random.split(k_perturb, num_layers)
    params["convs"] = [
        (w + 0.05 * jax.random.normal(pk[l], w.shape, dtype=jnp.float32), b)
        for l, (w, b) in enumerate(params["convs"])]

    kp = prepare_kernel_params(params, obs_shape, num_filters)

    obs = jax.random.uniform(k_obs, (batch,) + obs_shape,
                             dtype=jnp.float32, minval=0.0, maxval=255.0)
    # torch.randn_like(mu) equivalent, generated deterministically outside
    noise = jax.random.normal(k_noise, (batch, action_dim), dtype=jnp.float32)

    fwd = jax.jit(lambda o, n: actor_forward(
        kp, o, n, num_filters=num_filters, action_dim=action_dim,
        log_std_min=log_std_min, log_std_max=log_std_max))

    mu, pi, log_pi, log_std = fwd(obs, noise)
    jax.block_until_ready((mu, pi, log_pi, log_std))

    assert mu.shape == (batch, action_dim)
    assert pi.shape == (batch, action_dim)
    assert log_pi.shape == (batch, 1)
    assert log_std.shape == (batch, action_dim)
    for t in (mu, pi, log_pi, log_std):
        assert bool(jnp.all(jnp.isfinite(t)))

    # Reference check.  Tolerances are generous on purpose: the kernel keeps
    # activations in bf16 between layers, and the log_std range scaling (x6)
    # and the squash log-term amplify that rounding; structural/indexing bugs
    # produce O(1)+ errors and would still trip these bounds.
    mu_r, pi_r, log_pi_r, log_std_r = ref_forward(
        params, obs, noise, action_dim=action_dim,
        log_std_min=log_std_min, log_std_max=log_std_max)
    assert float(jnp.max(jnp.abs(mu - mu_r))) < 0.2
    assert float(jnp.max(jnp.abs(pi - pi_r))) < 0.2
    assert float(jnp.max(jnp.abs(log_std - log_std_r))) < 0.4
    assert float(jnp.max(jnp.abs(log_pi - log_pi_r))) < 3.0

    print("KERNEL_OK")
</pallas_src>

<mosaic_0001>
module attributes {stable_mosaic.version = 11 : i64} {
  func.func @_actor_fused_kernel(%arg0: memref<4x16x32xbf16, #tpu.memory_space<vmem>>, %arg1: memref<9x32x56xbf16, #tpu.memory_space<vmem>>, %arg2: memref<9x56x40xbf16, #tpu.memory_space<vmem>>, %arg3: memref<5x40x32xbf16, #tpu.memory_space<vmem>>, %arg4: memref<32x32xbf16, #tpu.memory_space<vmem>>, %arg5: memref<32x32xbf16, #tpu.memory_space<vmem>>, %arg6: memref<32x8xbf16, #tpu.memory_space<vmem>>, %arg7: memref<8x128xf32, #tpu.memory_space<vmem>>, %arg8: memref<2x4xf32, #tpu.memory_space<vmem>>, %arg9: memref<2x128xf32, #tpu.memory_space<vmem>>) attributes {dimension_semantics = [], scalar_prefetch = 0 : i64, scratch_operands = 0 : i64, tpu.core_type = #tpu.core_type<tc>} {
    %cst = arith.constant 0.000000e+00 : f32
    %0 = vector.broadcast %cst : f32 to vector<14x56xf32>
    %c0 = arith.constant 0 : index
    %c0_0 = arith.constant 0 : index
    %c0_1 = arith.constant 0 : index
    %1 = vector.load %arg0[%c0, %c0_0, %c0_1] : memref<4x16x32xbf16, #tpu.memory_space<vmem>>, vector<1x14x32xbf16>
    %2 = vector.shape_cast %1 : vector<1x14x32xbf16> to vector<14x32xbf16>
    %c0_2 = arith.constant 0 : index
    %c0_3 = arith.constant 0 : index
    %c0_4 = arith.constant 0 : index
    %3 = vector.load %arg1[%c0_2, %c0_3, %c0_4] : memref<9x32x56xbf16, #tpu.memory_space<vmem>>, vector<1x32x56xbf16>
    %4 = vector.shape_cast %3 : vector<1x32x56xbf16> to vector<32x56xbf16>
    %cst_5 = arith.constant dense<0.000000e+00> : vector<14x56xf32>
    %5 = tpu.matmul %2, %4, %cst_5 {dimension_numbers = #tpu.dot_dimension_numbers<[1], [0], [0], [1], [0, 0, 1, 1], [], []>} : vector<14x32xbf16>, vector<32x56xbf16>, vector<14x56xf32> -> vector<14x56xf32>
    %6 = arith.addf %0, %5 : vector<14x56xf32>
    %c1 = arith.constant 1 : index
    %c0_6 = arith.constant 0 : index
    %c0_7 = arith.constant 0 : index
    %7 = vector.load %arg0[%c1, %c0_6, %c0_7] : memref<4x16x32xbf16, #tpu.memory_space<vmem>>, vector<1x14x32xbf16>
    %8 = vector.shape_cast %7 : vector<1x14x32xbf16> to vector<14x32xbf16>
    %c1_8 = arith.constant 1 : index
    %c0_9 = arith.constant 0 : index
    %c0_10 = arith.constant 0 : index
    %9 = vector.load %arg1[%c1_8, %c0_9, %c0_10] : memref<9x32x56xbf16, #tpu.memory_space<vmem>>, vector<1x32x56xbf16>
    %10 = vector.shape_cast %9 : vector<1x32x56xbf16> to vector<32x56xbf16>
    %cst_11 = arith.constant dense<0.000000e+00> : vector<14x56xf32>
    %11 = tpu.matmul %8, %10, %cst_11 {dimension_numbers = #tpu.dot_dimension_numbers<[1], [0], [0], [1], [0, 0, 1, 1], [], []>} : vector<14x32xbf16>, vector<32x56xbf16>, vector<14x56xf32> -> vector<14x56xf32>
    %12 = arith.addf %6, %11 : vector<14x56xf32>
    %c0_12 = arith.constant 0 : index
    %c0_13 = arith.constant 0 : index
    %c0_14 = arith.constant 0 : index
    %13 = vector.load %arg0[%c0_12, %c0_13, %c0_14] : memref<4x16x32xbf16, #tpu.memory_space<vmem>>, vector<1x14x32xbf16>
    %14 = vector.shape_cast %13 : vector<1x14x32xbf16> to vector<14x32xbf16>
    %c2 = arith.constant 2 : index
    %c0_15 = arith.constant 0 : index
    %c0_16 = arith.constant 0 : index
    %15 = vector.load %arg1[%c2, %c0_15, %c0_16] : memref<9x32x56xbf16, #tpu.memory_space<vmem>>, vector<1x32x56xbf16>
    %16 = vector.shape_cast %15 : vector<1x32x56xbf16> to vector<32x56xbf16>
    %cst_17 = arith.constant dense<0.000000e+00> : vector<14x56xf32>
    %17 = tpu.matmul %14, %16, %cst_17 {dimension_numbers = #tpu.dot_dimension_numbers<[1], [0], [0], [1], [0, 0, 1, 1], [], []>} : vector<14x32xbf16>, vector<32x56xbf16>, vector<14x56xf32> -> vector<14x56xf32>
    %18 = arith.addf %12, %17 : vector<14x56xf32>
    %c2_18 = arith.constant 2 : index
    %c0_19 = arith.constant 0 : index
    %c0_20 = arith.constant 0 : index
    %19 = vector.load %arg0[%c2_18, %c0_19, %c0_20] : memref<4x16x32xbf16, #tpu.memory_space<vmem>>, vector<1x14x32xbf16>
    %20 = vector.shape_cast %19 : vector<1x14x32xbf16> to vector<14x32xbf16>
    %c3 = arith.constant 3 : index
    %c0_21 = arith.constant 0 : index
    %c0_22 = arith.constant 0 : index
    %21 = vector.load %arg1[%c3, %c0_21, %c0_22] : memref<9x32x56xbf16, #tpu.memory_space<vmem>>, vector<1x32x56xbf16>
    %22 = vector.shape_cast %21 : vector<1x32x56xbf16> to vector<32x56xbf16>
    %cst_23 = arith.constant dense<0.000000e+00> : vector<14x56xf32>
    %23 = tpu.matmul %20, %22, %cst_23 {dimension_numbers = #tpu.dot_dimension_numbers<[1], [0], [0], [1], [0, 0, 1, 1], [], []>} : vector<14x32xbf16>, vector<32x56xbf16>, vector<14x56xf32> -> vector<14x56xf32>
    %24 = arith.addf %18, %23 : vector<14x56xf32>
    %c3_24 = arith.constant 3 : index
    %c0_25 = arith.constant 0 : index
    %c0_26 = arith.constant 0 : index
    %25 = vector.load %arg0[%c3_24, %c0_25, %c0_26] : memref<4x16x32xbf16, #tpu.memory_space<vmem>>, vector<1x14x32xbf16>
    %26 = vector.shape_cast %25 : vector<1x14x32xbf16> to vector<14x32xbf16>
    %c4 = arith.constant 4 : index
    %c0_27 = arith.constant 0 : index
    %c0_28 = arith.constant 0 : index
    %27 = vector.load %arg1[%c4, %c0_27, %c0_28] : memref<9x32x56xbf16, #tpu.memory_space<vmem>>, vector<1x32x56xbf16>
    %28 = vector.shape_cast %27 : vector<1x32x56xbf16> to vector<32x56xbf16>
    %cst_29 = arith.constant dense<0.000000e+00> : vector<14x56xf32>
    %29 = tpu.matmul %26, %28, %cst_29 {dimension_numbers = #tpu.dot_dimension_numbers<[1], [0], [0], [1], [0, 0, 1, 1], [], []>} : vector<14x32xbf16>, vector<32x56xbf16>, vector<14x56xf32> -> vector<14x56xf32>
    %30 = arith.addf %24, %29 : vector<14x56xf32>
    %c2_30 = arith.constant 2 : index
    %c0_31 = arith.constant 0 : index
    %c0_32 = arith.constant 0 : index
    %31 = vector.load %arg0[%c2_30, %c0_31, %c0_32] : memref<4x16x32xbf16, #tpu.memory_space<vmem>>, vector<1x14x32xbf16>
    %32 = vector.shape_cast %31 : vector<1x14x32xbf16> to vector<14x32xbf16>
    %c5 = arith.constant 5 : index
    %c0_33 = arith.constant 0 : index
    %c0_34 = arith.constant 0 : index
    %33 = vector.load %arg1[%c5, %c0_33, %c0_34] : memref<9x32x56xbf16, #tpu.memory_space<vmem>>, vector<1x32x56xbf16>
    %34 = vector.shape_cast %33 : vector<1x32x56xbf16> to vector<32x56xbf16>
    %cst_35 = arith.constant dense<0.000000e+00> : vector<14x56xf32>
    %35 = tpu.matmul %32, %34, %cst_35 {dimension_numbers = #tpu.dot_dimension_numbers<[1], [0], [0], [1], [0, 0, 1, 1], [], []>} : vector<14x32xbf16>, vector<32x56xbf16>, vector<14x56xf32> -> vector<14x56xf32>
    %36 = arith.addf %30, %35 : vector<14x56xf32>
    %c0_36 = arith.constant 0 : index
    %c2_37 = arith.constant 2 : index
    %c0_38 = arith.constant 0 : index
    %37 = vector.load %arg0[%c0_36, %c2_37, %c0_38] : memref<4x16x32xbf16, #tpu.memory_space<vmem>>, vector<1x14x32xbf16>
    %38 = vector.shape_cast %37 : vector<1x14x32xbf16> to vector<14x32xbf16>
    %c6 = arith.constant 6 : index
    %c0_39 = arith.constant 0 : index
    %c0_40 = arith.constant 0 : index
    %39 = vector.load %arg1[%c6, %c0_39, %c0_40] : memref<9x32x56xbf16, #tpu.memory_space<vmem>>, vector<1x32x56xbf16>
    %40 = vector.shape_cast %39 : vector<1x32x56xbf16> to vector<32x56xbf16>
    %cst_41 = arith.constant dense<0.000000e+00> : vector<14x56xf32>
    %41 = tpu.matmul %38, %40, %cst_41 {dimension_numbers = #tpu.dot_dimension_numbers<[1], [0], [0], [1], [0, 0, 1, 1], [], []>} : vector<14x32xbf16>, vector<32x56xbf16>, vector<14x56xf32> -> vector<14x56xf32>
    %42 = arith.addf %36, %41 : vector<14x56xf32>
    %c1_42 = arith.constant 1 : index
    %c2_43 = arith.constant 2 : index
    %c0_44 = arith.constant 0 : index
    %43 = vector.load %arg0[%c1_42, %c2_43, %c0_44] : memref<4x16x32xbf16, #tpu.memory_space<vmem>>, vector<1x14x32xbf16>
    %44 = vector.shape_cast %43 : vector<1x14x32xbf16> to vector<14x32xbf16>
    %c7 = arith.constant 7 : index
    %c0_45 = arith.constant 0 : index
    %c0_46 = arith.constant 0 : index
    %45 = vector.load %arg1[%c7, %c0_45, %c0_46] : memref<9x32x56xbf16, #tpu.memory_space<vmem>>, vector<1x32x56xbf16>
    %46 = vector.shape_cast %45 : vector<1x32x56xbf16> to vector<32x56xbf16>
    %cst_47 = arith.constant dense<0.000000e+00> : vector<14x56xf32>
    %47 = tpu.matmul %44, %46, %cst_47 {dimension_numbers = #tpu.dot_dimension_numbers<[1], [0], [0], [1], [0, 0, 1, 1], [], []>} : vector<14x32xbf16>, vector<32x56xbf16>, vector<14x56xf32> -> vector<14x56xf32>
    %48 = arith.addf %42, %47 : vector<14x56xf32>
    %c0_48 = arith.constant 0 : index
    %c2_49 = arith.constant 2 : index
    %c0_50 = arith.constant 0 : index
    %49 = vector.load %arg0[%c0_48, %c2_49, %c0_50] : memref<4x16x32xbf16, #tpu.memory_space<vmem>>, vector<1x14x32xbf16>
    %50 = vector.shape_cast %49 : vector<1x14x32xbf16> to vector<14x32xbf16>
    %c8 = arith.constant 8 : index
    %c0_51 = arith.constant 0 : index
    %c0_52 = arith.constant 0 : index
    %51 = vector.load %arg1[%c8, %c0_51, %c0_52] : memref<9x32x56xbf16, #tpu.memory_space<vmem>>, vector<1x32x56xbf16>
    %52 = vector.shape_cast %51 : vector<1x32x56xbf16> to vector<32x56xbf16>
    %cst_53 = arith.constant dense<0.000000e+00> : vector<14x56xf32>
    %53 = tpu.matmul %50, %52, %cst_53 {dimension_numbers = #tpu.dot_dimension_numbers<[1], [0], [0], [1], [0, 0, 1, 1], [], []>} : vector<14x32xbf16>, vector<32x56xbf16>, vector<14x56xf32> -> vector<14x56xf32>
    %54 = arith.addf %48, %53 : vector<14x56xf32>
    %c0_54 = arith.constant 0 : index
    %c0_55 = arith.constant 0 : index
    %55 = vector.load %arg7[%c0_54, %c0_55] : memref<8x128xf32, #tpu.memory_space<vmem>>, vector<1x56xf32>
    %56 = vector.broadcast %55 : vector<1x56xf32> to vector<14x56xf32>
    %57 = arith.addf %54, %56 : vector<14x56xf32>
    %cst_56 = arith.constant 0.000000e+00 : f32
    %58 = vector.broadcast %cst_56 : f32 to vector<14x56xf32>
    %59 = arith.maximumf %57, %58 : vector<14x56xf32>
    %60 = arith.truncf %59 : vector<14x56xf32> to vector<14x56xbf16>
    %cst_57 = arith.constant 0.000000e+00 : f32
    %61 = vector.broadcast %cst_57 : f32 to vector<10x40xf32>
    %62 = vector.extract_strided_slice %60 {offsets = [0, 0], sizes = [10, 56], strides = [1, 1]} : vector<14x56xbf16> to vector<10x56xbf16>
    %c0_58 = arith.constant 0 : index
    %c0_59 = arith.constant 0 : index
    %c0_60 = arith.constant 0 : index
    %63 = vector.load %arg2[%c0_58, %c0_59, %c0_60] : memref<9x56x40xbf16, #tpu.memory_space<vmem>>, vector<1x56x40xbf16>
    %64 = vector.shape_cast %63 : vector<1x56x40xbf16> to vector<56x40xbf16>
    %cst_61 = arith.constant dense<0.000000e+00> : vector<10x40xf32>
    %65 = tpu.matmul %62, %64, %cst_61 {dimension_numbers = #tpu.dot_dimension_numbers<[1], [0], [0], [1], [0, 0, 1, 1], [], []>} : vector<10x56xbf16>, vector<56x40xbf16>, vector<10x40xf32> -> vector<10x40xf32>
    %66 = arith.addf %61, %65 : vector<10x40xf32>
    %c1_62 = arith.constant 1 : index
    %c0_63 = arith.constant 0 : index
    %c0_64 = arith.constant 0 : index
    %67 = vector.load %arg2[%c1_62, %c0_63, %c0_64] : memref<9x56x40xbf16, #tpu.memory_space<vmem>>, vector<1x56x40xbf16>
    %68 = vector.shape_cast %67 : vector<1x56x40xbf16> to vector<56x40xbf16>
    %cst_65 = arith.constant dense<0.000000e+00> : vector<10x40xf32>
    %69 = tpu.matmul %62, %68, %cst_65 {dimension_numbers = #tpu.dot_dimension_numbers<[1], [0], [0], [1], [0, 0, 1, 1], [], []>} : vector<10x56xbf16>, vector<56x40xbf16>, vector<10x40xf32> -> vector<10x40xf32>
    %70 = arith.addf %66, %69 : vector<10x40xf32>
    %c2_66 = arith.constant 2 : index
    %c0_67 = arith.constant 0 : index
    %c0_68 = arith.constant 0 : index
    %71 = vector.load %arg2[%c2_66, %c0_67, %c0_68] : memref<9x56x40xbf16, #tpu.memory_space<vmem>>, vector<1x56x40xbf16>
    %72 = vector.shape_cast %71 : vector<1x56x40xbf16> to vector<56x40xbf16>
    %cst_69 = arith.constant dense<0.000000e+00> : vector<10x40xf32>
    %73 = tpu.matmul %62, %72, %cst_69 {dimension_numbers = #tpu.dot_dimension_numbers<[1], [0], [0], [1], [0, 0, 1, 1], [], []>} : vector<10x56xbf16>, vector<56x40xbf16>, vector<10x40xf32> -> vector<10x40xf32>
    %74 = arith.addf %70, %73 : vector<10x40xf32>
    %75 = vector.extract_strided_slice %60 {offsets = [2, 0], sizes = [10, 56], strides = [1, 1]} : vector<14x56xbf16> to vector<10x56xbf16>
    %c3_70 = arith.constant 3 : index
    %c0_71 = arith.constant 0 : index
    %c0_72 = arith.constant 0 : index
    %76 = vector.load %arg2[%c3_70, %c0_71, %c0_72] : memref<9x56x40xbf16, #tpu.memory_space<vmem>>, vector<1x56x40xbf16>
    %77 = vector.shape_cast %76 : vector<1x56x40xbf16> to vector<56x40xbf16>
    %cst_73 = arith.constant dense<0.000000e+00> : vector<10x40xf32>
    %78 = tpu.matmul %75, %77, %cst_73 {dimension_numbers = #tpu.dot_dimension_numbers<[1], [0], [0], [1], [0, 0, 1, 1], [], []>} : vector<10x56xbf16>, vector<56x40xbf16>, vector<10x40xf32> -> vector<10x40xf32>
    %79 = arith.addf %74, %78 : vector<10x40xf32>
    %c4_74 = arith.constant 4 : index
    %c0_75 = arith.constant 0 : index
    %c0_76 = arith.constant 0 : index
    %80 = vector.load %arg2[%c4_74, %c0_75, %c0_76] : memref<9x56x40xbf16, #tpu.memory_space<vmem>>, vector<1x56x40xbf16>
    %81 = vector.shape_cast %80 : vector<1x56x40xbf16> to vector<56x40xbf16>
    %cst_77 = arith.constant dense<0.000000e+00> : vector<10x40xf32>
    %82 = tpu.matmul %75, %81, %cst_77 {dimension_numbers = #tpu.dot_dimension_numbers<[1], [0], [0], [1], [0, 0, 1, 1], [], []>} : vector<10x56xbf16>, vector<56x40xbf16>, vector<10x40xf32> -> vector<10x40xf32>
    %83 = arith.addf %79, %82 : vector<10x40xf32>
    %c5_78 = arith.constant 5 : index
    %c0_79 = arith.constant 0 : index
    %c0_80 = arith.constant 0 : index
    %84 = vector.load %arg2[%c5_78, %c0_79, %c0_80] : memref<9x56x40xbf16, #tpu.memory_space<vmem>>, vector<1x56x40xbf16>
    %85 = vector.shape_cast %84 : vector<1x56x40xbf16> to vector<56x40xbf16>
    %cst_81 = arith.constant dense<0.000000e+00> : vector<10x40xf32>
    %86 = tpu.matmul %75, %85, %cst_81 {dimension_numbers = #tpu.dot_dimension_numbers<[1], [0], [0], [1], [0, 0, 1, 1], [], []>} : vector<10x56xbf16>, vector<56x40xbf16>, vector<10x40xf32> -> vector<10x40xf32>
    %87 = arith.addf %83, %86 : vector<10x40xf32>
    %88 = vector.extract_strided_slice %60 {offsets = [4, 0], sizes = [10, 56], strides = [1, 1]} : vector<14x56xbf16> to vector<10x56xbf16>
    %c6_82 = arith.constant 6 : index
    %c0_83 = arith.constant 0 : index
    %c0_84 = arith.constant 0 : index
    %89 = vector.load %arg2[%c6_82, %c0_83, %c0_84] : memref<9x56x40xbf16, #tpu.memory_space<vmem>>, vector<1x56x40xbf16>
    %90 = vector.shape_cast %89 : vector<1x56x40xbf16> to vector<56x40xbf16>
    %cst_85 = arith.constant dense<0.000000e+00> : vector<10x40xf32>
    %91 = tpu.matmul %88, %90, %cst_85 {dimension_numbers = #tpu.dot_dimension_numbers<[1], [0], [0], [1], [0, 0, 1, 1], [], []>} : vector<10x56xbf16>, vector<56x40xbf16>, vector<10x40xf32> -> vector<10x40xf32>
    %92 = arith.addf %87, %91 : vector<10x40xf32>
    %c7_86 = arith.constant 7 : index
    %c0_87 = arith.constant 0 : index
    %c0_88 = arith.constant 0 : index
    %93 = vector.load %arg2[%c7_86, %c0_87, %c0_88] : memref<9x56x40xbf16, #tpu.memory_space<vmem>>, vector<1x56x40xbf16>
    %94 = vector.shape_cast %93 : vector<1x56x40xbf16> to vector<56x40xbf16>
    %cst_89 = arith.constant dense<0.000000e+00> : vector<10x40xf32>
    %95 = tpu.matmul %88, %94, %cst_89 {dimension_numbers = #tpu.dot_dimension_numbers<[1], [0], [0], [1], [0, 0, 1, 1], [], []>} : vector<10x56xbf16>, vector<56x40xbf16>, vector<10x40xf32> -> vector<10x40xf32>
    %96 = arith.addf %92, %95 : vector<10x40xf32>
    %c8_90 = arith.constant 8 : index
    %c0_91 = arith.constant 0 : index
    %c0_92 = arith.constant 0 : index
    %97 = vector.load %arg2[%c8_90, %c0_91, %c0_92] : memref<9x56x40xbf16, #tpu.memory_space<vmem>>, vector<1x56x40xbf16>
    %98 = vector.shape_cast %97 : vector<1x56x40xbf16> to vector<56x40xbf16>
    %cst_93 = arith.constant dense<0.000000e+00> : vector<10x40xf32>
    %99 = tpu.matmul %88, %98, %cst_93 {dimension_numbers = #tpu.dot_dimension_numbers<[1], [0], [0], [1], [0, 0, 1, 1], [], []>} : vector<10x56xbf16>, vector<56x40xbf16>, vector<10x40xf32> -> vector<10x40xf32>
    %100 = arith.addf %96, %99 : vector<10x40xf32>
    %c1_94 = arith.constant 1 : index
    %c0_95 = arith.constant 0 : index
    %101 = vector.load %arg7[%c1_94, %c0_95] : memref<8x128xf32, #tpu.memory_space<vmem>>, vector<1x40xf32>
    %102 = vector.broadcast %101 : vector<1x40xf32> to vector<10x40xf32>
    %103 = arith.addf %100, %102 : vector<10x40xf32>
    %cst_96 = arith.constant 0.000000e+00 : f32
    %104 = vector.broadcast %cst_96 : f32 to vector<10x40xf32>
    %105 = arith.maximumf %103, %104 : vector<10x40xf32>
    %106 = arith.truncf %105 : vector<10x40xf32> to vector<10x40xbf16>
    %cst_97 = arith.constant 0.000000e+00 : f32
    %107 = vector.broadcast %cst_97 : f32 to vector<2x32xf32>
    %108 = vector.extract_strided_slice %106 {offsets = [0, 0], sizes = [2, 40], strides = [1, 1]} : vector<10x40xbf16> to vector<2x40xbf16>
    %c0_98 = arith.constant 0 : index
    %c0_99 = arith.constant 0 : index
    %c0_100 = arith.constant 0 : index
    %109 = vector.load %arg3[%c0_98, %c0_99, %c0_100] : memref<5x40x32xbf16, #tpu.memory_space<vmem>>, vector<1x40x32xbf16>
    %110 = vector.shape_cast %109 : vector<1x40x32xbf16> to vector<40x32xbf16>
    %cst_101 = arith.constant dense<0.000000e+00> : vector<2x32xf32>
    %111 = tpu.matmul %108, %110, %cst_101 {dimension_numbers = #tpu.dot_dimension_numbers<[1], [0], [0], [1], [0, 0, 1, 1], [], []>} : vector<2x40xbf16>, vector<40x32xbf16>, vector<2x32xf32> -> vector<2x32xf32>
    %112 = arith.addf %107, %111 : vector<2x32xf32>
    %113 = vector.extract_strided_slice %106 {offsets = [2, 0], sizes = [2, 40], strides = [1, 1]} : vector<10x40xbf16> to vector<2x40xbf16>
    %c1_102 = arith.constant 1 : index
    %c0_103 = arith.constant 0 : index
    %c0_104 = arith.constant 0 : index
    %114 = vector.load %arg3[%c1_102, %c0_103, %c0_104] : memref<5x40x32xbf16, #tpu.memory_space<vmem>>, vector<1x40x32xbf16>
    %115 = vector.shape_cast %114 : vector<1x40x32xbf16> to vector<40x32xbf16>
    %cst_105 = arith.constant dense<0.000000e+00> : vector<2x32xf32>
    %116 = tpu.matmul %113, %115, %cst_105 {dimension_numbers = #tpu.dot_dimension_numbers<[1], [0], [0], [1], [0, 0, 1, 1], [], []>} : vector<2x40xbf16>, vector<40x32xbf16>, vector<2x32xf32> -> vector<2x32xf32>
    %117 = arith.addf %112, %116 : vector<2x32xf32>
    %118 = vector.extract_strided_slice %106 {offsets = [4, 0], sizes = [2, 40], strides = [1, 1]} : vector<10x40xbf16> to vector<2x40xbf16>
    %c2_106 = arith.constant 2 : index
    %c0_107 = arith.constant 0 : index
    %c0_108 = arith.constant 0 : index
    %119 = vector.load %arg3[%c2_106, %c0_107, %c0_108] : memref<5x40x32xbf16, #tpu.memory_space<vmem>>, vector<1x40x32xbf16>
    %120 = vector.shape_cast %119 : vector<1x40x32xbf16> to vector<40x32xbf16>
    %cst_109 = arith.constant dense<0.000000e+00> : vector<2x32xf32>
    %121 = tpu.matmul %118, %120, %cst_109 {dimension_numbers = #tpu.dot_dimension_numbers<[1], [0], [0], [1], [0, 0, 1, 1], [], []>} : vector<2x40xbf16>, vector<40x32xbf16>, vector<2x32xf32> -> vector<2x32xf32>
    %122 = arith.addf %117, %121 : vector<2x32xf32>
    %123 = vector.extract_strided_slice %106 {offsets = [6, 0], sizes = [2, 40], strides = [1, 1]} : vector<10x40xbf16> to vector<2x40xbf16>
    %c3_110 = arith.constant 3 : index
    %c0_111 = arith.constant 0 : index
    %c0_112 = arith.constant 0 : index
    %124 = vector.load %arg3[%c3_110, %c0_111, %c0_112] : memref<5x40x32xbf16, #tpu.memory_space<vmem>>, vector<1x40x32xbf16>
    %125 = vector.shape_cast %124 : vector<1x40x32xbf16> to vector<40x32xbf16>
    %cst_113 = arith.constant dense<0.000000e+00> : vector<2x32xf32>
    %126 = tpu.matmul %123, %125, %cst_113 {dimension_numbers = #tpu.dot_dimension_numbers<[1], [0], [0], [1], [0, 0, 1, 1], [], []>} : vector<2x40xbf16>, vector<40x32xbf16>, vector<2x32xf32> -> vector<2x32xf32>
    %127 = arith.addf %122, %126 : vector<2x32xf32>
    %128 = vector.extract_strided_slice %106 {offsets = [8, 0], sizes = [2, 40], strides = [1, 1]} : vector<10x40xbf16> to vector<2x40xbf16>
    %c4_114 = arith.constant 4 : index
    %c0_115 = arith.constant 0 : index
    %c0_116 = arith.constant 0 : index
    %129 = vector.load %arg3[%c4_114, %c0_115, %c0_116] : memref<5x40x32xbf16, #tpu.memory_space<vmem>>, vector<1x40x32xbf16>
    %130 = vector.shape_cast %129 : vector<1x40x32xbf16> to vector<40x32xbf16>
    %cst_117 = arith.constant dense<0.000000e+00> : vector<2x32xf32>
    %131 = tpu.matmul %128, %130, %cst_117 {dimension_numbers = #tpu.dot_dimension_numbers<[1], [0], [0], [1], [0, 0, 1, 1], [], []>} : vector<2x40xbf16>, vector<40x32xbf16>, vector<2x32xf32> -> vector<2x32xf32>
    %132 = arith.addf %127, %131 : vector<2x32xf32>
    %c2_118 = arith.constant 2 : index
    %c0_119 = arith.constant 0 : index
    %133 = vector.load %arg7[%c2_118, %c0_119] : memref<8x128xf32, #tpu.memory_space<vmem>>, vector<1x32xf32>
    %134 = vector.broadcast %133 : vector<1x32xf32> to vector<2x32xf32>
    %135 = arith.addf %132, %134 : vector<2x32xf32>
    %cst_120 = arith.constant dense<0.000000e+00> : vector<2xf32>
    %136 = vector.multi_reduction <add>, %135, %cst_120 [1] : vector<2x32xf32> to vector<2xf32>
    %137 = vector.shape_cast %136 : vector<2xf32> to vector<2x1xf32>
    %cst_121 = arith.constant 3.200000e+01 : f32
    %138 = vector.broadcast %cst_121 : f32 to vector<2x1xf32>
    %139 = arith.divf %137, %138 : vector<2x1xf32>
    %140 = vector.broadcast %139 : vector<2x1xf32> to vector<2x32xf32>
    %141 = arith.subf %135, %140 : vector<2x32xf32>
    %142 = vector.broadcast %139 : vector<2x1xf32> to vector<2x32xf32>
    %143 = arith.subf %135, %142 : vector<2x32xf32>
    %144 = arith.mulf %141, %143 : vector<2x32xf32>
    %cst_122 = arith.constant dense<0.000000e+00> : vector<2xf32>
    %145 = vector.multi_reduction <add>, %144, %cst_122 [1] : vector<2x32xf32> to vector<2xf32>
    %146 = vector.shape_cast %145 : vector<2xf32> to vector<2x1xf32>
    %cst_123 = arith.constant 3.200000e+01 : f32
    %147 = vector.broadcast %cst_123 : f32 to vector<2x1xf32>
    %148 = arith.divf %146, %147 : vector<2x1xf32>
    %149 = vector.broadcast %139 : vector<2x1xf32> to vector<2x32xf32>
    %150 = arith.subf %135, %149 : vector<2x32xf32>
    %cst_124 = arith.constant 9.99999974E-6 : f32
    %151 = vector.broadcast %cst_124 : f32 to vector<2x1xf32>
    %152 = arith.addf %148, %151 : vector<2x1xf32>
    %153 = math.rsqrt %152 : vector<2x1xf32>
    %154 = vector.broadcast %153 : vector<2x1xf32> to vector<2x32xf32>
    %155 = arith.mulf %150, %154 : vector<2x32xf32>
    %c3_125 = arith.constant 3 : index
    %c0_126 = arith.constant 0 : index
    %156 = vector.load %arg7[%c3_125, %c0_126] : memref<8x128xf32, #tpu.memory_space<vmem>>, vector<1x32xf32>
    %157 = vector.broadcast %156 : vector<1x32xf32> to vector<2x32xf32>
    %158 = arith.mulf %155, %157 : vector<2x32xf32>
    %c4_127 = arith.constant 4 : index
    %c0_128 = arith.constant 0 : index
    %159 = vector.load %arg7[%c4_127, %c0_128] : memref<8x128xf32, #tpu.memory_space<vmem>>, vector<1x32xf32>
    %160 = vector.broadcast %159 : vector<1x32xf32> to vector<2x32xf32>
    %161 = arith.addf %158, %160 : vector<2x32xf32>
    %162 = arith.truncf %161 : vector<2x32xf32> to vector<2x32xbf16>
    %c0_129 = arith.constant 0 : index
    %c0_130 = arith.constant 0 : index
    %163 = vector.load %arg4[%c0_129, %c0_130] : memref<32x32xbf16, #tpu.memory_space<vmem>>, vector<32x32xbf16>
    %cst_131 = arith.constant dense<0.000000e+00> : vector<2x32xf32>
    %164 = tpu.matmul %162, %163, %cst_131 {dimension_numbers = #tpu.dot_dimension_numbers<[1], [0], [0], [1], [0, 0, 1, 1], [], []>} : vector<2x32xbf16>, vector<32x32xbf16>, vector<2x32xf32> -> vector<2x32xf32>
    %c5_132 = arith.constant 5 : index
    %c0_133 = arith.constant 0 : index
    %165 = vector.load %arg7[%c5_132, %c0_133] : memref<8x128xf32, #tpu.memory_space<vmem>>, vector<1x32xf32>
    %166 = vector.broadcast %165 : vector<1x32xf32> to vector<2x32xf32>
    %167 = arith.addf %164, %166 : vector<2x32xf32>
    %cst_134 = arith.constant 0.000000e+00 : f32
    %168 = vector.broadcast %cst_134 : f32 to vector<2x32xf32>
    %169 = arith.maximumf %167, %168 : vector<2x32xf32>
    %170 = arith.truncf %169 : vector<2x32xf32> to vector<2x32xbf16>
    %c0_135 = arith.constant 0 : index
    %c0_136 = arith.constant 0 : index
    %171 = vector.load %arg5[%c0_135, %c0_136] : memref<32x32xbf16, #tpu.memory_space<vmem>>, vector<32x32xbf16>
    %cst_137 = arith.constant dense<0.000000e+00> : vector<2x32xf32>
    %172 = tpu.matmul %170, %171, %cst_137 {dimension_numbers = #tpu.dot_dimension_numbers<[1], [0], [0], [1], [0, 0, 1, 1], [], []>} : vector<2x32xbf16>, vector<32x32xbf16>, vector<2x32xf32> -> vector<2x32xf32>
    %c6_138 = arith.constant 6 : index
    %c0_139 = arith.constant 0 : index
    %173 = vector.load %arg7[%c6_138, %c0_139] : memref<8x128xf32, #tpu.memory_space<vmem>>, vector<1x32xf32>
    %174 = vector.broadcast %173 : vector<1x32xf32> to vector<2x32xf32>
    %175 = arith.addf %172, %174 : vector<2x32xf32>
    %cst_140 = arith.constant 0.000000e+00 : f32
    %176 = vector.broadcast %cst_140 : f32 to vector<2x32xf32>
    %177 = arith.maximumf %175, %176 : vector<2x32xf32>
    %178 = arith.truncf %177 : vector<2x32xf32> to vector<2x32xbf16>
    %c0_141 = arith.constant 0 : index
    %c0_142 = arith.constant 0 : index
    %179 = vector.load %arg6[%c0_141, %c0_142] : memref<32x8xbf16, #tpu.memory_space<vmem>>, vector<32x8xbf16>
    %cst_143 = arith.constant dense<0.000000e+00> : vector<2x8xf32>
    %180 = tpu.matmul %178, %179, %cst_143 {dimension_numbers = #tpu.dot_dimension_numbers<[1], [0], [0], [1], [0, 0, 1, 1], [], []>} : vector<2x32xbf16>, vector<32x8xbf16>, vector<2x8xf32> -> vector<2x8xf32>
    %c7_144 = arith.constant 7 : index
    %c0_145 = arith.constant 0 : index
    %181 = vector.load %arg7[%c7_144, %c0_145] : memref<8x128xf32, #tpu.memory_space<vmem>>, vector<1x8xf32>
    %182 = vector.broadcast %181 : vector<1x8xf32> to vector<2x8xf32>
    %183 = arith.addf %180, %182 : vector<2x8xf32>
    %184 = vector.extract_strided_slice %183 {offsets = [0, 0], sizes = [2, 4], strides = [1, 1]} : vector<2x8xf32> to vector<2x4xf32>
    %185 = vector.extract_strided_slice %183 {offsets = [0, 4], sizes = [2, 4], strides = [1, 1]} : vector<2x8xf32> to vector<2x4xf32>
    %186 = math.tanh %185 : vector<2x4xf32>
    %cst_146 = arith.constant 6.000000e+00 : f32
    %187 = vector.broadcast %cst_146 : f32 to vector<2x4xf32>
    %188 = arith.mulf %187, %186 : vector<2x4xf32>
    %cst_147 = arith.constant -4.000000e+00 : f32
    %189 = vector.broadcast %cst_147 : f32 to vector<2x4xf32>
    %190 = arith.addf %189, %188 : vector<2x4xf32>
    %191 = math.exp %190 : vector<2x4xf32>
    %c0_148 = arith.constant 0 : index
    %c0_149 = arith.constant 0 : index
    %192 = vector.load %arg8[%c0_148, %c0_149] : memref<2x4xf32, #tpu.memory_space<vmem>>, vector<2x4xf32>
    %193 = arith.mulf %192, %191 : vector<2x4xf32>
    %194 = arith.addf %184, %193 : vector<2x4xf32>
    %cst_150 = arith.constant -5.000000e-01 : f32
    %195 = vector.broadcast %cst_150 : f32 to vector<2x4xf32>
    %196 = arith.mulf %195, %192 : vector<2x4xf32>
    %197 = arith.mulf %196, %192 : vector<2x4xf32>
    %198 = arith.subf %197, %190 : vector<2x4xf32>
    %cst_151 = arith.constant dense<0.000000e+00> : vector<2xf32>
    %199 = vector.multi_reduction <add>, %198, %cst_151 [1] : vector<2x4xf32> to vector<2xf32>
    %200 = vector.shape_cast %199 : vector<2xf32> to vector<2x1xf32>
    %cst_152 = arith.constant 3.67575407 : f32
    %201 = vector.broadcast %cst_152 : f32 to vector<2x1xf32>
    %202 = arith.subf %200, %201 : vector<2x1xf32>
    %203 = math.tanh %184 : vector<2x4xf32>
    %204 = math.tanh %194 : vector<2x4xf32>
    %205 = arith.mulf %204, %204 : vector<2x4xf32>
    %cst_153 = arith.constant 1.000000e+00 : f32
    %206 = vector.broadcast %cst_153 : f32 to vector<2x4xf32>
    %207 = arith.subf %206, %205 : vector<2x4xf32>
    %cst_154 = arith.constant 0.000000e+00 : f32
    %208 = vector.broadcast %cst_154 : f32 to vector<2x4xf32>
    %209 = arith.maximumf %207, %208 : vector<2x4xf32>
    %cst_155 = arith.constant 9.99999997E-7 : f32
    %210 = vector.broadcast %cst_155 : f32 to vector<2x4xf32>
    %211 = arith.addf %209, %210 : vector<2x4xf32>
    %212 = math.log %211 : vector<2x4xf32>
    %cst_156 = arith.constant dense<0.000000e+00> : vector<2xf32>
    %213 = vector.multi_reduction <add>, %212, %cst_156 [1] : vector<2x4xf32> to vector<2xf32>
    %214 = vector.shape_cast %213 : vector<2xf32> to vector<2x1xf32>
    %215 = arith.subf %202, %214 : vector<2x1xf32>
    %cst_157 = arith.constant 0.000000e+00 : f32
    %216 = vector.broadcast %cst_157 : f32 to vector<2x115xf32>
    %217 = tpu.concatenate %203, %204, %190, %215, %216 in 1 : vector<2x4xf32>, vector<2x4xf32>, vector<2x4xf32>, vector<2x1xf32>, vector<2x115xf32> -> vector<2x128xf32>
    %c0_158 = arith.constant 0 : index
    %c0_159 = arith.constant 0 : index
    %218 = vector.load %arg9[%c0_158, %c0_159] : memref<2x128xf32, #tpu.memory_space<vmem>>, vector<2x128xf32>
    tpu.vector_store %arg9[%c0_158, %c0_159], %217 {strides = array<i32>} : memref<2x128xf32, #tpu.memory_space<vmem>>, vector<2x128xf32>,
    return
  }
}

</mosaic_0001>

<bundles_post_ra>
// kernel: _lambda_.1
= control target key start
LH: loop header
LB: loop body
LE: loop exit
PB: predicated region body
PF: predicated region fallthrough
CT: control target
= control target key end

     0   :  { %v2648_v0 = vmov 0.0   ;;  %vm2649_vm0 = vmmov 0   ;;  %vm64_vm1 = vcmask 261120   ;;  %vm684_vm2 = vcmask 1043456   ;;  %s3151_s1 = inlined_call_operand.vmem [shape: bf16[9,32,56], index: 1, kind: input, shape index: {}]   ;;  %s3152_s0 = inlined_call_operand.vmem [shape: bf16[4,16,32], index: 0, kind: input, shape index: {}]   ;;  %s3153_s2 = inlined_call_operand.vmem [shape: bf16[9,56,40], index: 2, kind: input, shape index: {}]   ;;  %s3154_s7 = inlined_call_operand.vmem [shape: f32[8,128], index: 7, kind: input, shape index: {}]   ;;  %s3155_s3 = inlined_call_operand.vmem [shape: bf16[5,40,32], index: 3, kind: input, shape index: {}]   ;;  %s3156_s4 = inlined_call_operand.vmem [shape: bf16[32,32], index: 4, kind: input, shape index: {}]   ;;  %s3157_s5 = inlined_call_operand.vmem [shape: bf16[32,32], index: 5, kind: input, shape index: {}]   ;;  %s3158_s6 = inlined_call_operand.vmem [shape: bf16[32,8], index: 6, kind: input, shape index: {}]   ;;  %s3159_s8 = inlined_call_operand.vmem [shape: f32[2,4], index: 8, kind: input, shape index: {}]   ;;  %s3160_s9 = inlined_call_operand.vmem [shape: f32[2,128], index: 9, kind: output, shape index: {}]  }
   0x1   :  { %2299 = vmatprep.subr.bf16.mxu0 %v2648_v0  ;;  %2307 = vmatprep.subr.bf16.mxu1 %v2648_v0  ;;  %v2557_v1 = vld [vmem:[%s3151_s1 + $0x10] sm:$0xff]   ;;  %v2558_v2 = vld [vmem:[%s3151_s1] sm:$0xff]   ;;  %v2559_v3 = vld [vmem:[%s3151_s1 + $0x18] sm:$0xff]   ;;  %vm680_vm3 = vcmask 457728   ;;  %vm1366_vm4 = vcmask 326656   ;;  %vm1687_vm5 = vcmask 254976  }
   0x2   :  { %2303 = vmatprep.mubr.msk.bf16.mxu0 %vm2649_vm0, %v2648_v0  ;;  %2311 = vmatprep.mubr.msk.bf16.mxu1 %vm2649_vm0, %v2648_v0  ;;  %v2560_v4 = vld [vmem:[%s3151_s1 + $0x8] sm:$0xff]   ;;  %v2562_v6 = vld [vmem:[%s3152_s0] sm:$0x7f]   ;;  %v2564_v8 = vld [vmem:[%s3151_s1 + $0x30] sm:$0xff]   ;;  %vm1930_vm6 = vcmask 25600   ;;  %vm1953_vm7 = vcmask 31744  }
   0x3   :  { %2300 = vmatpush3.bf16.msra.mxu0 %v2557_v1  ;;  %2308 = vmatpush3.bf16.msra.mxu1 %v2558_v2  ;;  %v2561_v5 = vld [vmem:[%s3152_s0 + $0x8] sm:$0x7f]   ;;  %v2563_v7 = vld [vmem:[%s3151_s1 + $0x20] sm:$0xff]   ;;  %v2566_v10 = vld [vmem:[%s3151_s1 + $0x38] sm:$0xff]   ;;  %vm1955_vm8 = vcmask 64512   ;;  %vm1957_vm9 = vcmask 97280  }
   0x4   :  { %2301 = vmatprep.subr.bf16.mxu0 %v2648_v0  ;;  %2309 = vmatprep.subr.bf16.mxu1 %v2648_v0  ;;  %v2565_v9 = vld [vmem:[%s3151_s1 + $0x28] sm:$0xff]   ;;  %v2567_v11 = vld [vmem:[%s3151_s1 + $0x40] sm:$0xff]   ;;  %v2568_v12 = vld [vmem:[%s3152_s0 + $0x10] sm:$0x7f]   ;;  %vm1959_vm10 = vcmask 105472  }
   0x5   :  { %v2569_v13 = vld [vmem:[%s3151_s1 + $0x50] sm:$0xff]   ;;  %v2570_v14 = vld [vmem:[%s3151_s1 + $0x48] sm:$0xff]   ;;  %v2571_v15 = vld [vmem:[%s3151_s1 + $0x58] sm:$0xff]  }
   0x6   :  { %v2572_v16 = vld [vmem:[%s3152_s0 + $0x18] sm:$0x7f]   ;;  %v2573_v17 = vld [vmem:[%s3151_s1 + $0x60] sm:$0xff]   ;;  %v2574_v18 = vld [vmem:[%s3151_s1 + $0x70] sm:$0xff]  }
   0x7   :  { %2302 = vmatpush3.bf16.msra.mxu0 %v2559_v3  ;;  %2310 = vmatpush3.bf16.msra.mxu1 %v2560_v4  ;;  %v2577_v19 = vld [vmem:[%s3152_s0] sm:$0xfe]   ;;  %v2575_v20 = vld [vmem:[%s3151_s1 + $0x68] sm:$0xff]   ;;  %v2576_v22 = vld [vmem:[%s3151_s1 + $0x78] sm:$0xff]  }
   0x8   :  { %2315 = vmatprep.subr.bf16.mxu0 %v2648_v0  ;;  %2323 = vmatprep.subr.bf16.mxu1 %v2648_v0  ;;  %v2579_v21 = vld [vmem:[%s3152_s0 + $0x8] sm:$0xfe]   ;;  %v444_v23 = vrot.slane %v2577_v19, 1  ;;  %v2578_v24 = vld [vmem:[%s3151_s1 + $0x80] sm:$0xff]   ;;  %v2586_v32 = vld [vmem:[%s3153_s2 + $0x10] sm:$0xff]  }
   0x9   :  { %v515_v25 = vrot.slane %v2579_v21, 1  ;;  %v2580_v26 = vld [vmem:[%s3151_s1 + $0x88] sm:$0xff]   ;;  %v2581_v27 = vld [vmem:[%s3153_s2 + $0x1c] sm:$0xff]   ;;  %v2587_v33 = vld [vmem:[%s3153_s2 + $0x34] ss:$0 sps:$4 sm:$0xff]  }
   0xa   :  { %2304 = vmatmul.mubr.msk.bf16.vlgmr.msra.gmra.mrb[0].mxu0 %vm64_vm1, %v2561_v5  ;;  %2312 = vmatmul.mubr.msk.bf16.vlgmr.msra.gmra.mrb[0].mxu1 %vm64_vm1, %v2562_v6  ;;  %v2582_v28 = vld [vmem:[%s3153_s2] sm:$0xff]   ;;  %v2584_v30 = vld [vmem:[%s3153_s2 + $0x8] sm:$0xff]   ;;  %v2588_v34 = vld [vmem:[%s3153_s2 + $0x18] ss:$0 sps:$4 sm:$0xff]   ;;  %v686_v35 = vsel %vm684_vm2, %v2587_v33, 0 }
   0xb   :  { %2316 = vmatpush3.bf16.msra.mxu0 %v2563_v7  ;;  %2324 = vmatpush3.bf16.msra.mxu1 %v2564_v8  ;;  %v2583_v29 = vld [vmem:[%s3153_s2 + $0x24] sm:$0xff]   ;;  %v2585_v31 = vld [vmem:[%s3153_s2 + $0x2c] sm:$0xff]   ;;  %v751_v36 = vsel %vm684_vm2, %v2588_v34, 0  ;;  %v2039_v21 = vld [vmem:[%s3154_s7] ss:$0 sm:$0xff] }
   0xc   :  { %2317 = vmatprep.subr.bf16.mxu0 %v2648_v0  ;;  %2325 = vmatprep.subr.bf16.mxu1 %v2648_v0  ;;  %v2591_v34 = vld [vmem:[%s3153_s2 + $0x40] sm:$0xff]  }
   0xd   :  { %2319 = vmatprep.mubr.msk.bf16.mxu0 %vm2649_vm0, %v2648_v0  ;;  %2327 = vmatprep.mubr.msk.bf16.mxu1 %vm2649_vm0, %v2648_v0 }
   0xf   :  { %2318 = vmatpush3.bf16.msra.mxu0 %v2565_v9  ;;  %2326 = vmatpush3.bf16.msra.mxu1 %v2566_v10 }
  0x10   :  { %2331 = vmatprep.subr.bf16.mxu0 %v2648_v0  ;;  %2339 = vmatprep.subr.bf16.mxu1 %v2648_v0 }
  0x12   :  { %2320 = vmatmul.mubr.msk.bf16.vlgmr.msra.gmra.mrb[4].mxu0 %vm64_vm1, %v2562_v6  ;;  %2328 = vmatmul.mubr.msk.bf16.vlgmr.msra.gmra.mrb[4].mxu1 %vm64_vm1, %v2568_v12 }
  0x13   :  { %2332 = vmatpush3.bf16.msra.mxu0 %v2567_v11  ;;  %2340 = vmatpush3.bf16.msra.mxu1 %v2569_v13 }
  0x14   :  { %2333 = vmatprep.subr.bf16.mxu0 %v2648_v0  ;;  %2341 = vmatprep.subr.bf16.mxu1 %v2648_v0 }
  0x15   :  { %2335 = vmatprep.mubr.msk.bf16.mxu0 %vm2649_vm0, %v2648_v0  ;;  %2343 = vmatprep.mubr.msk.bf16.mxu1 %vm2649_vm0, %v2648_v0 }
  0x17   :  { %2334 = vmatpush3.bf16.msra.mxu0 %v2570_v14  ;;  %2342 = vmatpush3.bf16.msra.mxu1 %v2571_v15 }
  0x18   :  { %2347 = vmatprep.subr.bf16.mxu0 %v2648_v0  ;;  %2355 = vmatprep.subr.bf16.mxu1 %v2648_v0 }
  0x1a   :  { %2336 = vmatmul.mubr.msk.bf16.vlgmr.msra.gmra.mrb[8].mxu0 %vm64_vm1, %v2572_v16  ;;  %2344 = vmatmul.mubr.msk.bf16.vlgmr.msra.gmra.mrb[8].mxu1 %vm64_vm1, %v2568_v12 }
  0x1b   :  { %2348 = vmatpush3.bf16.msra.mxu0 %v2573_v17  ;;  %2356 = vmatpush3.bf16.msra.mxu1 %v2574_v18 }
  0x1c   :  { %2349 = vmatprep.subr.bf16.mxu0 %v2648_v0  ;;  %2357 = vmatprep.subr.bf16.mxu1 %v2648_v0 }
  0x1d   :  { %2351 = vmatprep.mubr.msk.bf16.mxu0 %vm2649_vm0, %v2648_v0  ;;  %2359 = vmatprep.mubr.msk.bf16.mxu1 %vm2649_vm0, %v2648_v0 }
  0x1f   :  { %2350 = vmatpush3.bf16.msra.mxu0 %v2575_v20  ;;  %2358 = vmatpush3.bf16.msra.mxu1 %v2576_v22 }
  0x20   :  { %2363 = vmatprep.subr.bf16.mxu0 %v2648_v0  ;;  %2371 = vmatprep.subr.bf16.mxu1 %v2648_v0 }
  0x22   :  { %2352 = vmatmul.mubr.msk.bf16.vlgmr.msra.gmra.mrb[12].mxu0 %vm64_vm1, %v444_v23  ;;  %2360 = vmatmul.mubr.msk.bf16.vlgmr.msra.gmra.mrb[12].mxu1 %vm64_vm1, %v515_v25 }
  0x23   :  { %2364 = vmatpush3.bf16.msra.mxu0 %v2578_v24  ;;  %2367 = vmatprep.mubr.msk.bf16.mxu0 %vm2649_vm0, %v2648_v0 }
  0x24   :  { %2365 = vmatprep.subr.bf16.mxu0 %v2648_v0  ;;  %2379 = vmatprep.mubr.msk.bf16.mxu1 %vm2649_vm0, %v2648_v0 }
  0x25   :  { %2372 = vmatpush3.bf16.msra.mxu1 %v2581_v27 }
  0x26   :  { %2373 = vmatprep.subr.bf16.mxu1 %v2648_v0 }
  0x27   :  { %2366 = vmatpush3.bf16.msra.mxu0 %v2580_v26 }
  0x28   :  { %2383 = vmatprep.subr.bf16.mxu0 %v2648_v0 }
  0x29   :  { %2374 = vmatpush3.bf16.msra.mxu1 %v2583_v29 }
  0x2a   :  { %2368 = vmatmul.mubr.msk.bf16.vlgmr.msra.gmra.mrb[16].mxu0 %vm64_vm1, %v444_v23  ;;  %2375 = vmatprep.subr.bf16.mxu1 %v2648_v0 }
  0x2b   :  { %2391 = vmatprep.mubr.msk.bf16.mxu0 %vm2649_vm0, %v2648_v0  ;;  %2384 = vmatpush3.bf16.msra.mxu0 %v2582_v28 }
  0x2c   :  { %2385 = vmatprep.subr.bf16.mxu0 %v2648_v0 }
  0x2d   :  { %2376 = vmatpush3.bf16.msra.mxu1 %v2585_v31  ;;  %v2589_v31 = vld [vmem:[%s3153_s2 + $0x38] sm:$0xff]  }
  0x2e   :  { %2377 = vmatprep.subr.bf16.mxu1 %v2648_v0 }
  0x2f   :  { %2386 = vmatpush3.bf16.msra.mxu0 %v2584_v30 }
  0x30   :  { %2387 = vmatprep.subr.bf16.mxu0 %v2648_v0 }
  0x31   :  { %2378 = vmatpush3.bf16.msra.mxu1 %v686_v35  ;;  %v2592_v35 = vld [vmem:[%s3153_s2 + $0x5c] sm:$0xff]  }
  0x32   :  { %2395 = vmatprep.subr.bf16.mxu1 %v2648_v0 }
  0x33   :  { %2388 = vmatpush3.bf16.msra.mxu0 %v2586_v32  ;;  %v2590_v32 = vld [vmem:[%s3153_s2 + $0x54] sm:$0xff]  }
  0x34   :  { %2389 = vmatprep.subr.bf16.mxu0 %v2648_v0 }
  0x37   :  { %2390 = vmatpush3.bf16.msra.mxu0 %v751_v36  ;;  %v2593_v36 = vld [vmem:[%s3153_s2 + $0x48] sm:$0xff]  }
  0x38   :  { %2407 = vmatprep.subr.bf16.mxu0 %v2648_v0 }
  0xdd   :  { %v102_v37 = vpop.f32.mrb[0].mxu0  ;;  %v163_v38 = vpop.f32.mrb[0].mxu1 }
  0xde   :  { %v2305_v39 = vpop.f32.mrb[1].mxu0  ;;  %v164_v40 = vadd.f32 %v163_v38, %v102_v37  ;;  %v2313_v41 = vpop.f32.mrb[1].mxu1  ;;  %v2594_v37 = vld [vmem:[%s3153_s2 + $0x64] sm:$0xff]   ;;  %v2595_v38 = vld [vmem:[%s3153_s2 + $0x50] ss:$0 sps:$4 sm:$0xff]  }
  0xdf   :  { %v105_v42 = vpop.f32.mrb[2].mxu0  ;;  %v166_v43 = vpop.f32.mrb[2].mxu1  ;;  %v2596_v39 = vld [vmem:[%s3153_s2 + $0x6c] ss:$0 sps:$4 sm:$0xff]  }
  0xe0   :  { %v2306_v44 = vpop.f32.mrb[3].mxu0  ;;  %v167_v45 = vadd.f32 %v166_v43, %v105_v42  ;;  %v2314_v46 = vpop.f32.mrb[3].mxu1  ;;  %v904_v41 = vsel %vm684_vm2, %v2596_v39, 0  ;;  %v2597_v42 = vld [vmem:[%s3153_s2 + $0x70] sm:$0xff]  }
  0xe1   :  { %v2598_v43 = vld [vmem:[%s3153_s2 + $0x8c] sm:$0xff]   ;;  %v2600_v46 = vld [vmem:[%s3153_s2 + $0x94] sm:$0xff]  }
  0xe5   :  { %v221_v47 = vpop.f32.mrb[4].mxu0  ;;  %v292_v50 = vpop.f32.mrb[4].mxu1 }
  0xe6   :  { %v228_v48 = vadd.f32 %v221_v47, %v164_v40  ;;  %v2321_v49 = vpop.f32.mrb[5].mxu0  ;;  %v2329_v52 = vpop.f32.mrb[5].mxu1  ;;  %v824_v40 = vsel %vm684_vm2, %v2595_v38, 0  ;;  %v2601_v47 = vld [vmem:[%s3153_s2 + $0x80] sm:$0xff]  }
  0xe7   :  { %v224_v51 = vpop.f32.mrb[6].mxu0  ;;  %v295_v56 = vpop.f32.mrb[6].mxu1  ;;  %v2603_v49 = vld [vmem:[%s3153_s2 + $0x88] ss:$0 sps:$4 sm:$0xff]  }
  0xe8   :  { %v229_v53 = vadd.f32 %v224_v51, %v167_v45  ;;  %v299_v54 = vadd.f32 %v292_v50, %v228_v48  ;;  %v2322_v55 = vpop.f32.mrb[7].mxu0  ;;  %v2330_v57 = vpop.f32.mrb[7].mxu1  ;;  %v2599_v45 = vld [vmem:[%s3153_s2 + $0x78] sm:$0xff]   ;;  %v2604_v50 = vld [vmem:[%s3153_s2 + $0xa4] ss:$0 sps:$4 sm:$0xff]   ;;  %v979_v51 = vsel %vm684_vm2, %v2603_v49, 0 }
  0xe9   :  { %v2602_v48 = vld [vmem:[%s3153_s2 + $0x9c] sm:$0xff]   ;;  %v1054_v52 = vsel %vm684_vm2, %v2604_v50, 0  ;;  %v2607_v55 = vld [vmem:[%s3153_s2 + $0xb0] sm:$0xff]  }
  0xea   :  { %v300_v58 = vadd.f32 %v295_v56, %v229_v53  ;;  %v2605_v53 = vld [vmem:[%s3153_s2 + $0xa8] sm:$0xff]   ;;  %v2609_v57 = vld [vmem:[%s3153_s2 + $0xb8] sm:$0xff]  }
  0xeb   :  { %v2608_v56 = vld [vmem:[%s3153_s2 + $0xcc] sm:$0xff]  }
  0xed   :  { %v363_v59 = vpop.f32.mrb[8].mxu0  ;;  %v423_v62 = vpop.f32.mrb[8].mxu1 }
  0xee   :  { %v370_v60 = vadd.f32 %v363_v59, %v299_v54  ;;  %v2337_v61 = vpop.f32.mrb[9].mxu0  ;;  %v2345_v1 = vpop.f32.mrb[9].mxu1  ;;  %v2606_v54 = vld [vmem:[%s3153_s2 + $0xc4] sm:$0xff]   ;;  %v2611_v59 = vld [vmem:[%s3153_s2 + $0xc0] ss:$0 sps:$4 sm:$0xff]  }
  0xef   :  { %v366_v63 = vpop.f32.mrb[10].mxu0  ;;  %v426_v5 = vpop.f32.mrb[10].mxu1  ;;  %v1133_v61 = vsel %vm684_vm2, %v2611_v59, 0 }
  0xf0   :  { %v371_v2 = vadd.f32 %v366_v63, %v300_v58  ;;  %v430_v3 = vadd.f32 %v423_v62, %v370_v60  ;;  %v2338_v4 = vpop.f32.mrb[11].mxu0  ;;  %v2346_v6 = vpop.f32.mrb[11].mxu1  ;;  %v2610_v58 = vld [vmem:[%s3153_s2 + $0xd4] sm:$0xff]   ;;  %v2612_v60 = vld [vmem:[%s3153_s2 + $0xdc] ss:$0 sps:$4 sm:$0xff]   ;;  %v2613_v63 = vld [vmem:[%s3153_s2 + $0xe0] sm:$0xff]  }
  0xf1   :  { %v1208_v62 = vsel %vm684_vm2, %v2612_v60, 0  ;;  %v2616_v4 = vld [vmem:[%s3153_s2 + $0xf8] ss:$0 sps:$4 sm:$0xff]   ;;  %v2617_v6 = vld [vmem:[%s3155_s3] sm:$0xff]  }
  0xf2   :  { %v431_v7 = vadd.f32 %v426_v5, %v371_v2  ;;  %v2614_v2 = vld [vmem:[%s3153_s2 + $0xe8] sm:$0xff]   ;;  %v1283_v5 = vsel %vm684_vm2, %v2616_v4, 0 }
  0xf5   :  { %v494_v8 = vpop.f32.mrb[12].mxu0  ;;  %v565_v11 = vpop.f32.mrb[12].mxu1 }
  0xf6   :  { %v501_v9 = vadd.f32 %v494_v8, %v430_v3  ;;  %v2353_v10 = vpop.f32.mrb[13].mxu0  ;;  %v2361_v13 = vpop.f32.mrb[13].mxu1  ;;  %v2615_v3 = vld [vmem:[%s3153_s2 + $0xf0] sm:$0xff]   ;;  %v2619_v8 = vld [vmem:[%s3155_s3 + $0x8] sm:$0xff]  }
  0xf7   :  { %v497_v12 = vpop.f32.mrb[14].mxu0  ;;  %v568_v17 = vpop.f32.mrb[14].mxu1  ;;  %v2621_v10 = vld [vmem:[%s3155_s3 + $0x10] ss:$0 sps:$4 sm:$0xff]  }
  0xf8   :  { %v502_v14 = vadd.f32 %v497_v12, %v431_v7  ;;  %v572_v15 = vadd.f32 %v565_v11, %v501_v9  ;;  %v2354_v16 = vpop.f32.mrb[15].mxu0  ;;  %v2362_v18 = vpop.f32.mrb[15].mxu1  ;;  %v2618_v7 = vld [vmem:[%s3155_s3 + $0x14] sm:$0xff]   ;;  %v2620_v9 = vld [vmem:[%s3155_s3 + $0x1c] sm:$0xff]   ;;  %v1432_v11 = vsel %vm684_vm2, %v2621_v10, 0  ;;  %v2624_v10 = vld [vmem:[%s3155_s3 + $0x28] sm:$0xff]  }
  0xf9   :  { %v2622_v12 = vld [vmem:[%s3155_s3 + $0x24] ss:$0 sps:$4 sm:$0xff]  }
  0xfa   :  { %v573_v19 = vadd.f32 %v568_v17, %v502_v14  ;;  %v1371_v13 = vsel %vm684_vm2, %v2622_v12, 0  ;;  %v2625_v12 = vld [vmem:[%s3155_s3 + $0x44] sm:$0xff]  }
  0xfd   :  { %v625_v20 = vpop.f32.mrb[16].mxu0 }
  0xfe   :  { %v632_v22 = vadd.f32 %v625_v20, %v572_v15  ;;  %v2369_v23 = vpop.f32.mrb[17].mxu0 }
  0xff   :  { %v628_v24 = vpop.f32.mrb[18].mxu0 }
 0x100   :  { %v639_v25 = vadd.f32 %v2039_v21, %v632_v22  ;;  %v633_v26 = vadd.f32 %v628_v24, %v573_v19  ;;  %v2370_v27 = vpop.f32.mrb[19].mxu0 }
 0x102   :  { %v640_v28 = vadd.f32 %v2039_v21, %v633_v26  ;;  %v641_v29 = vmax.f32 %v639_v25, 0.0 }
 0x104   :  { %v642_v30 = vmax.f32 %v640_v28, 0.0 }
 0x106   :  { %v2868_v33 = vpack.c.bf16 %v642_v30, %v641_v29 }
 0x108   :  { %2380 = vmatmul.mubr.msk.bf16.vlgmr.msra.gmra.mrb[16].mxu1 %vm680_vm3, %v2868_v33  ;;  %2392 = vmatmul.mubr.msk.bf16.vlgmr.msra.gmra.mrb[20].mxu0 %vm680_vm3, %v2868_v33  ;;  %v878_v44 = vrot.slane %v2868_v33, 1  ;;  %v1107_v1 = vrot.slane %v2868_v33, 2 }
 0x109   :  { %2396 = vmatpush3.bf16.msra.mxu1 %v2589_v31  ;;  %2408 = vmatpush3.bf16.msra.mxu0 %v2590_v32 }
 0x10a   :  { %2397 = vmatprep.subr.bf16.mxu1 %v2648_v0  ;;  %2409 = vmatprep.subr.bf16.mxu0 %v2648_v0 }
 0x10b   :  { %2403 = vmatprep.mubr.msk.bf16.mxu1 %vm2649_vm0, %v2648_v0  ;;  %2415 = vmatprep.mubr.msk.bf16.mxu0 %vm2649_vm0, %v2648_v0 }
 0x10d   :  { %2398 = vmatpush3.bf16.msra.mxu1 %v2591_v34  ;;  %2410 = vmatpush3.bf16.msra.mxu0 %v2592_v35 }
 0x10e   :  { %2399 = vmatprep.subr.bf16.mxu1 %v2648_v0  ;;  %2411 = vmatprep.subr.bf16.mxu0 %v2648_v0 }
 0x111   :  { %2400 = vmatpush3.bf16.msra.mxu1 %v2593_v36  ;;  %2412 = vmatpush3.bf16.msra.mxu0 %v2594_v37 }
 0x112   :  { %2401 = vmatprep.subr.bf16.mxu1 %v2648_v0  ;;  %2413 = vmatprep.subr.bf16.mxu0 %v2648_v0 }
 0x115   :  { %2402 = vmatpush3.bf16.msra.mxu1 %v824_v40  ;;  %2414 = vmatpush3.bf16.msra.mxu0 %v904_v41 }
 0x116   :  { %2419 = vmatprep.subr.bf16.mxu1 %v2648_v0  ;;  %2431 = vmatprep.subr.bf16.mxu0 %v2648_v0 }
 0x118   :  { %2404 = vmatmul.mubr.msk.bf16.vlgmr.msra.gmra.mrb[20].mxu1 %vm680_vm3, %v2868_v33  ;;  %2416 = vmatmul.mubr.msk.bf16.vlgmr.msra.gmra.mrb[24].mxu0 %vm680_vm3, %v878_v44 }
 0x119   :  { %2420 = vmatpush3.bf16.msra.mxu1 %v2597_v42  ;;  %2432 = vmatpush3.bf16.msra.mxu0 %v2598_v43 }
 0x11a   :  { %2421 = vmatprep.subr.bf16.mxu1 %v2648_v0  ;;  %2433 = vmatprep.subr.bf16.mxu0 %v2648_v0 }
 0x11b   :  { %2427 = vmatprep.mubr.msk.bf16.mxu1 %vm2649_vm0, %v2648_v0  ;;  %2439 = vmatprep.mubr.msk.bf16.mxu0 %vm2649_vm0, %v2648_v0 }
 0x11d   :  { %2422 = vmatpush3.bf16.msra.mxu1 %v2599_v45  ;;  %2434 = vmatpush3.bf16.msra.mxu0 %v2600_v46 }
 0x11e   :  { %2423 = vmatprep.subr.bf16.mxu1 %v2648_v0  ;;  %2435 = vmatprep.subr.bf16.mxu0 %v2648_v0 }
 0x121   :  { %2424 = vmatpush3.bf16.msra.mxu1 %v2601_v47  ;;  %2436 = vmatpush3.bf16.msra.mxu0 %v2602_v48 }
 0x122   :  { %2425 = vmatprep.subr.bf16.mxu1 %v2648_v0  ;;  %2437 = vmatprep.subr.bf16.mxu0 %v2648_v0 }
 0x125   :  { %2426 = vmatpush3.bf16.msra.mxu1 %v979_v51  ;;  %2438 = vmatpush3.bf16.msra.mxu0 %v1054_v52 }
 0x126   :  { %2443 = vmatprep.subr.bf16.mxu1 %v2648_v0  ;;  %2455 = vmatprep.subr.bf16.mxu0 %v2648_v0 }
 0x128   :  { %2428 = vmatmul.mubr.msk.bf16.vlgmr.msra.gmra.mrb[24].mxu1 %vm680_vm3, %v878_v44  ;;  %2440 = vmatmul.mubr.msk.bf16.vlgmr.msra.gmra.mrb[28].mxu0 %vm680_vm3, %v878_v44 }
 0x129   :  { %2444 = vmatpush3.bf16.msra.mxu1 %v2605_v53  ;;  %2456 = vmatpush3.bf16.msra.mxu0 %v2606_v54 }
 0x12a   :  { %2445 = vmatprep.subr.bf16.mxu1 %v2648_v0  ;;  %2457 = vmatprep.subr.bf16.mxu0 %v2648_v0 }
 0x12b   :  { %2451 = vmatprep.mubr.msk.bf16.mxu1 %vm2649_vm0, %v2648_v0  ;;  %2463 = vmatprep.mubr.msk.bf16.mxu0 %vm2649_vm0, %v2648_v0 }
 0x12d   :  { %2446 = vmatpush3.bf16.msra.mxu1 %v2607_v55  ;;  %2458 = vmatpush3.bf16.msra.mxu0 %v2608_v56 }
 0x12e   :  { %2447 = vmatprep.subr.bf16.mxu1 %v2648_v0  ;;  %2459 = vmatprep.subr.bf16.mxu0 %v2648_v0 }
 0x131   :  { %2448 = vmatpush3.bf16.msra.mxu1 %v2609_v57  ;;  %2460 = vmatpush3.bf16.msra.mxu0 %v2610_v58 }
 0x132   :  { %2449 = vmatprep.subr.bf16.mxu1 %v2648_v0  ;;  %2461 = vmatprep.subr.bf16.mxu0 %v2648_v0 }
 0x135   :  { %2450 = vmatpush3.bf16.msra.mxu1 %v1133_v61  ;;  %2462 = vmatpush3.bf16.msra.mxu0 %v1208_v62  ;;  %v2141_v61 = vld [vmem:[%s3154_s7 + $0x1] ss:$0 sm:$0xff] }
 0x136   :  { %2467 = vmatprep.subr.bf16.mxu1 %v2648_v0  ;;  %2479 = vmatprep.subr.bf16.mxu0 %v2648_v0 }
 0x138   :  { %2452 = vmatmul.mubr.msk.bf16.vlgmr.msra.gmra.mrb[28].mxu1 %vm680_vm3, %v1107_v1  ;;  %2464 = vmatmul.mubr.msk.bf16.vlgmr.msra.gmra.mrb[32].mxu0 %vm680_vm3, %v1107_v1 }
 0x139   :  { %2468 = vmatpush3.bf16.msra.mxu1 %v2613_v63  ;;  %2475 = vmatprep.mubr.msk.bf16.mxu1 %vm2649_vm0, %v2648_v0 }
 0x13a   :  { %2469 = vmatprep.subr.bf16.mxu1 %v2648_v0  ;;  %2485 = vmatprep.mubr.msk.bf16.mxu0 %vm2649_vm0, %v2648_v0 }
 0x13b   :  { %2480 = vmatpush3.bf16.msra.mxu0 %v2618_v7 }
 0x13c   :  { %2481 = vmatprep.subr.bf16.mxu0 %v2648_v0 }
 0x13d   :  { %2470 = vmatpush3.bf16.msra.mxu1 %v2614_v2 }
 0x13e   :  { %2471 = vmatprep.subr.bf16.mxu1 %v2648_v0 }
 0x13f   :  { %2482 = vmatpush3.bf16.msra.mxu0 %v2620_v9 }
 0x140   :  { %2483 = vmatprep.subr.bf16.mxu0 %v2648_v0 }
 0x141   :  { %2472 = vmatpush3.bf16.msra.mxu1 %v2615_v3 }
 0x142   :  { %2473 = vmatprep.subr.bf16.mxu1 %v2648_v0 }
 0x143   :  { %2484 = vmatpush3.bf16.msra.mxu0 %v1371_v13  ;;  %v2627_v13 = vld [vmem:[%s3155_s3 + $0x4c] ss:$0 sps:$4 sm:$0xff]  }
 0x144   :  { %2499 = vmatprep.subr.bf16.mxu0 %v2648_v0 }
 0x145   :  { %2474 = vmatpush3.bf16.msra.mxu1 %v1283_v5 }
 0x146   :  { %2489 = vmatprep.subr.bf16.mxu1 %v2648_v0 }
 0x148   :  { %2476 = vmatmul.mubr.msk.bf16.vlgmr.msra.gmra.mrb[32].mxu1 %vm680_vm3, %v1107_v1 }
 0x149   :  { %2495 = vmatprep.mubr.msk.bf16.mxu1 %vm2649_vm0, %v2648_v0  ;;  %2490 = vmatpush3.bf16.msra.mxu1 %v2617_v6 }
 0x14a   :  { %2491 = vmatprep.subr.bf16.mxu1 %v2648_v0 }
 0x14d   :  { %2492 = vmatpush3.bf16.msra.mxu1 %v2619_v8  ;;  %v2623_v8 = vld [vmem:[%s3155_s3 + $0x3c] sm:$0xff]  }
 0x14e   :  { %2493 = vmatprep.subr.bf16.mxu1 %v2648_v0 }
 0x151   :  { %2494 = vmatpush3.bf16.msra.mxu1 %v1432_v11 }
 0x152   :  { %2509 = vmatprep.subr.bf16.mxu1 %v2648_v0 }
 0x1db   :  { %v722_v14 = vpop.f32.mrb[16].mxu1  ;;  %v787_v15 = vpop.f32.mrb[20].mxu0 }
 0x1dc   :  { %v788_v16 = vadd.f32 %v787_v15, %v722_v14  ;;  %v2381_v17 = vpop.f32.mrb[17].mxu1  ;;  %v2393_v18 = vpop.f32.mrb[21].mxu0  ;;  %v2626_v14 = vld [vmem:[%s3155_s3 + $0x30] sm:$0xff]   ;;  %v2628_v15 = vld [vmem:[%s3155_s3 + $0x38] ss:$0 sps:$4 sm:$0xff]  }
 0x1dd   :  { %v725_v19 = vpop.f32.mrb[18].mxu1  ;;  %v790_v20 = vpop.f32.mrb[22].mxu0  ;;  %v1500_v17 = vsel %vm684_vm2, %v2628_v15, 0 }
 0x1de   :  { %v791_v21 = vadd.f32 %v790_v20, %v725_v19  ;;  %v2382_v22 = vpop.f32.mrb[19].mxu1  ;;  %v2394_v23 = vpop.f32.mrb[23].mxu0  ;;  %v2629_v19 = vld [vmem:[%s3155_s3 + $0x50] sm:$0xff]  }
 0x1df   :  { %v2631_v22 = vld [vmem:[%s3155_s3 + $0x60] ss:$0 sps:$4 sm:$0xff]  }
 0x1e0   :  { %v1638_v23 = vsel %vm684_vm2, %v2631_v22, 0 }
 0x1eb   :  { %v860_v24 = vpop.f32.mrb[20].mxu1  ;;  %v940_v25 = vpop.f32.mrb[24].mxu0 }
 0x1ec   :  { %v867_v26 = vadd.f32 %v860_v24, %v788_v16  ;;  %v2405_v27 = vpop.f32.mrb[21].mxu1  ;;  %v2417_v28 = vpop.f32.mrb[25].mxu0  ;;  %v1569_v16 = vsel %vm684_vm2, %v2627_v13, 0 }
 0x1ed   :  { %v863_v29 = vpop.f32.mrb[22].mxu1  ;;  %v943_v30 = vpop.f32.mrb[26].mxu0 }
 0x1ee   :  { %v947_v31 = vadd.f32 %v940_v25, %v867_v26  ;;  %v868_v32 = vadd.f32 %v863_v29, %v791_v21  ;;  %v2406_v33 = vpop.f32.mrb[23].mxu1  ;;  %v2418_v34 = vpop.f32.mrb[27].mxu0  ;;  %v2630_v21 = vld [vmem:[%s3155_s3 + $0x58] sm:$0xff]  }
 0x1f0   :  { %v948_v35 = vadd.f32 %v943_v30, %v868_v32 }
 0x1fb   :  { %v1015_v36 = vpop.f32.mrb[24].mxu1  ;;  %v1090_v37 = vpop.f32.mrb[28].mxu0 }
 0x1fc   :  { %v1022_v38 = vadd.f32 %v1015_v36, %v947_v31  ;;  %v2429_v39 = vpop.f32.mrb[25].mxu1  ;;  %v2441_v40 = vpop.f32.mrb[29].mxu0 }
 0x1fd   :  { %v1018_v41 = vpop.f32.mrb[26].mxu1  ;;  %v1093_v42 = vpop.f32.mrb[30].mxu0 }
 0x1fe   :  { %v1097_v43 = vadd.f32 %v1090_v37, %v1022_v38  ;;  %v1023_v44 = vadd.f32 %v1018_v41, %v948_v35  ;;  %v2430_v45 = vpop.f32.mrb[27].mxu1  ;;  %v2442_v46 = vpop.f32.mrb[31].mxu0 }
 0x1ff   :  { %v2182_v45 = vld [vmem:[%s3154_s7 + $0x2] ss:$0 sm:$0xff] }
 0x200   :  { %v1098_v47 = vadd.f32 %v1093_v42, %v1023_v44 }
 0x20b   :  { %v1169_v48 = vpop.f32.mrb[28].mxu1  ;;  %v1244_v49 = vpop.f32.mrb[32].mxu0 }
 0x20c   :  { %v1176_v50 = vadd.f32 %v1169_v48, %v1097_v43  ;;  %v2453_v51 = vpop.f32.mrb[29].mxu1  ;;  %v2465_v52 = vpop.f32.mrb[33].mxu0 }
 0x20d   :  { %v1172_v53 = vpop.f32.mrb[30].mxu1  ;;  %v1247_v54 = vpop.f32.mrb[34].mxu0 }
 0x20e   :  { %v1251_v55 = vadd.f32 %v1244_v49, %v1176_v50  ;;  %v1177_v56 = vadd.f32 %v1172_v53, %v1098_v47  ;;  %v2454_v57 = vpop.f32.mrb[31].mxu1  ;;  %v2466_v58 = vpop.f32.mrb[35].mxu0 }
 0x20f   :  { %v2632_v57 = vld [vmem:[%s3156_s4] sm:$0xff]   ;;  %v2633_v58 = vld [vmem:[%s3156_s4 + $0x8] sm:$0xff]  }
 0x210   :  { %v1252_v59 = vadd.f32 %v1247_v54, %v1177_v56 }
 0x21b   :  { %v1319_v60 = vpop.f32.mrb[32].mxu1 }
 0x21c   :  { %v1326_v62 = vadd.f32 %v1319_v60, %v1251_v55  ;;  %v2477_v63 = vpop.f32.mrb[33].mxu1 }
 0x21d   :  { %v1322_v1 = vpop.f32.mrb[34].mxu1  ;;  %v2183_v63 = vld [vmem:[%s3154_s7 + $0x3] ss:$0 sm:$0xff] }
 0x21e   :  { %v1333_v2 = vadd.f32 %v2141_v61, %v1326_v62  ;;  %v1327_v3 = vadd.f32 %v1322_v1, %v1252_v59  ;;  %v2478_v4 = vpop.f32.mrb[35].mxu1 }
 0x220   :  { %v1334_v5 = vadd.f32 %v2141_v61, %v1327_v3  ;;  %v1335_v6 = vmax.f32 %v1333_v2, 0.0  ;;  %v2184_v2 = vld [vmem:[%s3154_s7 + $0x4] ss:$0 sm:$0xff] }
 0x222   :  { %v1336_v7 = vmax.f32 %v1334_v5, 0.0 }
 0x224   :  { %v1337_v9 = vpack.c.bf16 %v1336_v7, %v1335_v6  ;;  %v2634_v6 = vld [vmem:[%s3157_s5] sm:$0xff]   ;;  %v2635_v7 = vld [vmem:[%s3157_s5 + $0x8] sm:$0xff]  }
 0x226   :  { %2496 = vmatmul.mubr.msk.bf16.vlgmr.msra.gmra.mrb[36].mxu1 %vm1366_vm4, %v1337_v9  ;;  %v1350_v11 = vrot.slane %v1337_v9, 1  ;;  %v1549_v18 = vrot.slane %v1337_v9, 3  ;;  %v1480_v20 = vrot.slane %v1337_v9, 2  ;;  %v1618_v24 = vrot.slane %v1337_v9, 4 }
 0x227   :  { %2510 = vmatpush3.bf16.msra.mxu1 %v2623_v8  ;;  %2515 = vmatprep.mubr.msk.bf16.mxu1 %vm2649_vm0, %v2648_v0  ;;  %v2185_v8 = vld [vmem:[%s3154_s7 + $0x5] ss:$0 sm:$0xff] }
 0x228   :  { %2486 = vmatmul.mubr.msk.bf16.vlgmr.msra.gmra.mrb[36].mxu0 %vm1366_vm4, %v1350_v11  ;;  %2511 = vmatprep.subr.bf16.mxu1 %v2648_v0 }
 0x229   :  { %2500 = vmatpush3.bf16.msra.mxu0 %v2624_v10  ;;  %2505 = vmatprep.mubr.msk.bf16.mxu0 %vm2649_vm0, %v2648_v0 }
 0x22a   :  { %2501 = vmatprep.subr.bf16.mxu0 %v2648_v0 }
 0x22b   :  { %2512 = vmatpush3.bf16.msra.mxu1 %v2625_v12 }
 0x22c   :  { %2513 = vmatprep.subr.bf16.mxu1 %v2648_v0 }
 0x22d   :  { %2502 = vmatpush3.bf16.msra.mxu0 %v2626_v14 }
 0x22e   :  { %2503 = vmatprep.subr.bf16.mxu0 %v2648_v0 }
 0x22f   :  { %2514 = vmatpush3.bf16.msra.mxu1 %v1569_v16  ;;  %v2636_v16 = vld [vmem:[%s3158_s6] sm:$0xff]  }
 0x230   :  { %2529 = vmatprep.subr.bf16.mxu1 %v2648_v0 }
 0x231   :  { %2504 = vmatpush3.bf16.msra.mxu0 %v1500_v17  ;;  %v2637_v17 = vld [vmem:[%s3158_s6 + $0x8] sm:$0xff]   ;;  %s2650_s6 = smov 124  }
 0x232   :  { %2516 = vmatmul.mubr.msk.bf16.vlgmr.msra.gmra.mrb[40].mxu1 %vm1366_vm4, %v1549_v18  ;;  %2519 = vmatprep.subr.bf16.mxu0 %v2648_v0  ;;  %v2189_v18 = vld [vmem:[%s3154_s7 + $0x6] ss:$0 sm:$0xff] }
 0x233   :  { %2533 = vmatprep.mubr.msk.bf16.mxu1 %vm2649_vm0, %v2648_v0  ;;  %2530 = vmatpush3.bf16.msra.mxu1 %v2632_v57 }
 0x234   :  { %2506 = vmatmul.mubr.msk.bf16.vlgmr.msra.gmra.mrb[40].mxu0 %vm1366_vm4, %v1480_v20  ;;  %2531 = vmatprep.subr.bf16.mxu1 %v2648_v0 }
 0x235   :  { %2520 = vmatpush3.bf16.msra.mxu0 %v2629_v19  ;;  %2525 = vmatprep.mubr.msk.bf16.mxu0 %vm2649_vm0, %v2648_v0 }
 0x236   :  { %2521 = vmatprep.subr.bf16.mxu0 %v2648_v0 }
 0x237   :  { %2532 = vmatpush3.bf16.msra.mxu1 %v2633_v58 }
 0x238   :  { %2545 = vmatprep.subr.bf16.mxu1 %v2648_v0 }
 0x239   :  { %2522 = vmatpush3.bf16.msra.mxu0 %v2630_v21 }
 0x23a   :  { %2523 = vmatprep.subr.bf16.mxu0 %v2648_v0 }
 0x23d   :  { %2524 = vmatpush3.bf16.msra.mxu0 %v1638_v23 }
 0x23e   :  { %2537 = vmatprep.subr.bf16.mxu0 %v2648_v0 }
 0x240   :  { %2526 = vmatmul.mubr.msk.bf16.vlgmr.msra.gmra.mrb[44].mxu0 %vm1366_vm4, %v1618_v24 }
 0x241   :  { %2541 = vmatprep.mubr.msk.bf16.mxu0 %vm2649_vm0, %v2648_v0  ;;  %2538 = vmatpush3.bf16.msra.mxu0 %v2634_v6 }
 0x242   :  { %2539 = vmatprep.subr.bf16.mxu0 %v2648_v0 }
 0x245   :  { %2540 = vmatpush3.bf16.msra.mxu0 %v2635_v7 }
 0x2f9   :  { %v1468_v25 = vpop.f32.mrb[36].mxu1 }
 0x2fa   :  { %v2497_v26 = vpop.f32.mrb[37].mxu1 }
 0x2fb   :  { %v1407_v27 = vpop.f32.mrb[36].mxu0  ;;  %v1471_v28 = vpop.f32.mrb[38].mxu1 }
 0x2fc   :  { %v1469_v29 = vadd.f32 %v1468_v25, %v1407_v27  ;;  %v2487_v30 = vpop.f32.mrb[37].mxu0  ;;  %v2498_v31 = vpop.f32.mrb[39].mxu1 }
 0x2fd   :  { %v1410_v32 = vpop.f32.mrb[38].mxu0 }
 0x2fe   :  { %v2488_v33 = vpop.f32.mrb[39].mxu0 }
 0x305   :  { %v1605_v34 = vpop.f32.mrb[40].mxu1 }
 0x306   :  { %v2517_v35 = vpop.f32.mrb[41].mxu1 }
 0x307   :  { %v1536_v36 = vpop.f32.mrb[40].mxu0  ;;  %v1608_v37 = vpop.f32.mrb[42].mxu1 }
 0x308   :  { %v1542_v38 = vadd.f32 %v1536_v36, %v1469_v29  ;;  %v2507_v39 = vpop.f32.mrb[41].mxu0  ;;  %v2518_v40 = vpop.f32.mrb[43].mxu1  ;;  %v1916_v36 = vld [vmem:[%s3159_s8] sm:$0x3] }
 0x309   :  { %v1539_v41 = vpop.f32.mrb[42].mxu0  ;;  %v1923_v37 = vmul.f32 -0.5, %v1916_v36 }
 0x30a   :  { %v2508_v42 = vpop.f32.mrb[43].mxu0  ;;  %v1611_v43 = vadd.f32 %v1605_v34, %v1542_v38 }
 0x30b   :  { %v1924_v40 = vmul.f32 %v1923_v37, %v1916_v36 }
 0x313   :  { %v1674_v44 = vpop.f32.mrb[44].mxu0 }
 0x314   :  { %v1680_v46 = vadd.f32 %v1674_v44, %v1611_v43  ;;  %v2527_v47 = vpop.f32.mrb[45].mxu0 }
 0x315   :  { %v1677_v48 = vpop.f32.mrb[46].mxu0 }
 0x316   :  { %v2528_v49 = vpop.f32.mrb[47].mxu0  ;;  %v1686_v50 = vadd.f32 %v2182_v45, %v1680_v46 }
 0x318   :  { %v1688_v51 = vsel %vm1687_vm5, %v1686_v50, 0.0 }
 0x319   :  { %1689 = vadd.xlane.f32.xlu0 %v1688_v51 }
 0x3a6   :  { %v1690_v52 = vpop.xlane.xlu0 %1689 }
 0x3a7   :  { %v1692_v53 = vmul.f32 0.03125, %v1690_v52 }
 0x3a9   :  { %v1693_v54 = vsub.f32 %v1686_v50, %v1692_v53 }
 0x3ab   :  { %v1694_v55 = vmul.f32 %v1693_v54, %v1693_v54 }
 0x3ad   :  { %v1695_v56 = vsel %vm1687_vm5, %v1694_v55, 0.0 }
 0x3ae   :  { %1696 = vadd.xlane.f32.xlu0 %v1695_v56 }
 0x43b   :  { %v1697_v59 = vpop.xlane.xlu0 %1696 }
 0x43c   :  { %v1698_v60 = vmul.f32 0.03125, %v1697_v59 }
 0x43e   :  { %v1699_v61 = vadd.f32 1e-05, %v1698_v60 }
 0x440   :  { %2638 = vrsqrt.f32 %v1699_v61 }
 0x44a   :  { %v2639_v62 = vpop.eup %2638 }
 0x44b   :  { %v1701_v1 = vmul.f32 %v2639_v62, %v1693_v54 }
 0x44d   :  { %v1707_v3 = vmul.f32 %v2183_v63, %v1701_v1 }
 0x44f   :  { %v1713_v4 = vadd.f32 %v2184_v2, %v1707_v3 }
 0x451   :  { %v1714_v5 = vpack.c.bf16 %v1713_v4, %v1713_v4 }
 0x453   :  { %2534 = vmatmul.mubr.msk.bf16.vlgmr.msra.gmra.mrb[44].mxu1 %vm64_vm1, %v1714_v5 }
 0x454   :  { %2549 = vmatprep.mubr.msk.bf16.mxu1 %vm2649_vm0, %v2648_v0  ;;  %2546 = vmatpush3.bf16.msra.mxu1 %v2636_v16 }
 0x455   :  { %2547 = vmatprep.subr.bf16.mxu1 %v2648_v0  ;;  %v2193_v0 = vld [vmem:[%s3154_s7 + $0x7] ss:$0 sm:$0xff]  ;;  %s2651_s7 = smov 4  }
 0x458   :  { %2548 = vmatpush3.bf16.msra.mxu1 %v2637_v17 }
 0x526   :  { %v1773_v9 = vpop.f32.mrb[44].mxu1 }
 0x527   :  { %v1774_v10 = vadd.f32 %v2185_v8, %v1773_v9  ;;  %v2535_v11 = vpop.f32.mrb[45].mxu1 }
 0x528   :  { %v1776_v12 = vpop.f32.mrb[46].mxu1 }
 0x529   :  { %v1779_v13 = vmax.f32 %v1774_v10, 0.0  ;;  %v2536_v14 = vpop.f32.mrb[47].mxu1 }
 0x52b   :  { %v1780_v15 = vpack.c.bf16 %v1779_v13, %v1779_v13 }
 0x52d   :  { %2542 = vmatmul.mubr.msk.bf16.vlgmr.msra.gmra.mrb[48].mxu0 %vm64_vm1, %v1780_v15 }
 0x600   :  { %v1839_v19 = vpop.f32.mrb[48].mxu0 }
 0x601   :  { %v1840_v20 = vadd.f32 %v2189_v18, %v1839_v19  ;;  %v2543_v21 = vpop.f32.mrb[49].mxu0 }
 0x602   :  { %v1842_v22 = vpop.f32.mrb[50].mxu0 }
 0x603   :  { %v1845_v23 = vmax.f32 %v1840_v20, 0.0  ;;  %v2544_v24 = vpop.f32.mrb[51].mxu0 }
 0x605   :  { %v1846_v25 = vpack.c.bf16 %v1845_v23, %v1845_v23 }
 0x607   :  { %2550 = vmatmul.mubr.msk.bf16.vlgmr.msra.gmra.mrb[48].mxu1 %vm64_vm1, %v1846_v25 }
 0x6da   :  { %v1905_v26 = vpop.f32.mrb[48].mxu1 }
 0x6db   :  { %v1906_v27 = vadd.f32 %v2193_v0, %v1905_v26  ;;  %v2551_v28 = vpop.f32.mrb[49].mxu1 }
 0x6dc   :  { %v1908_v29 = vpop.f32.mrb[50].mxu1 }
 0x6dd   :  { %2640 = vtanh.f32 %v1906_v27  ;;  %v2552_v30 = vpop.f32.mrb[51].mxu1 }
 0x6e7   :  { %v2641_v31 = vpop.eup %2640 }
 0x6e8   :  { %v1912_v32 = vmul.f32 6.0, %v2641_v31 }
 0x6ea   :  { %v1913_v33 = vadd.f32 -4.0, %v1912_v32 }
 0x6ec   :  { %v1914_v34 = vmul.f32 1.442695, %v1913_v33 }
 0x6ee   :  { %2642 = vpow2.f32 %v1914_v34 }
 0x6f8   :  { %v2643_v35 = vpop.eup %2642 }
 0x6f9   :  { %1918 = vrot.lane.b32.xlu1 %v2643_v35, %s2650_s6 }
 0x6fd   :  { %1926 = vrot.lane.b32.xlu1 %v1913_v33, %s2650_s6 }
 0x76b   :  { %v1919_v38 = vpop.permute.xlu1 %1918 }
 0x76c   :  { %v1921_v39 = vmul.f32 %v1919_v38, %v1916_v36 }
 0x76e   :  { %v1922_v41 = vadd.f32 %v1921_v39, %v1906_v27 }
 0x76f   :  { %v1927_v42 = vpop.permute.xlu1 %1926 }
 0x770   :  { %2644 = vtanh.f32 %v1922_v41  ;;  %v1929_v43 = vsub.f32 %v1924_v40, %v1927_v42 }
 0x772   :  { %v1931_v44 = vsel %vm1930_vm6, %v1929_v43, 0.0 }
 0x773   :  { %1932 = vadd.xlane.f32.xlu0 %v1931_v44 }
 0x77a   :  { %v2645_v45 = vpop.eup %2644 }
 0x77b   :  { %v1936_v46 = vmul.f32 %v2645_v45, %v2645_v45 }
 0x77d   :  { %v1937_v47 = vsub.f32 1.0, %v1936_v46 }
 0x77f   :  { %v1938_v48 = vmax.f32 %v1937_v47, 0.0 }
 0x781   :  { %v1939_v49 = vadd.f32 1e-06, %v1938_v48 }
 0x783   :  { %2646 = vlog2.f32 %v1939_v49 }
 0x789   :  { %1947 = vrot.lane.b32.xlu0 %v2645_v45, %s2651_s7 }
 0x78d   :  { %v2647_v50 = vpop.eup %2646  ;;  %1950 = vrot.lane.b32.xlu0 %v1913_v33, %s2651_s7 }
 0x78e   :  { %v1941_v51 = vmul.f32 0.6931472, %v2647_v50 }
 0x790   :  { %v1942_v52 = vsel %vm1930_vm6, %v1941_v51, 0.0 }
 0x791   :  { %1943 = vadd.xlane.f32.xlu1 %v1942_v52 }
 0x800   :  { %v1933_v53 = vpop.xlane.xlu0 %1932 }
 0x801   :  { %v2197_v55 = vadd.f32 -3.675754, %v1933_v53 }
 0x804   :  { %v1948_v54 = vpop.permute.xlu0 %1947 }
 0x805   :  { %v1954_v58 = vsel %vm1953_vm7, %v2641_v31, %v1948_v54 }
 0x808   :  { %v1951_v56 = vpop.permute.xlu0 %1950 }
 0x809   :  { %v1956_v60 = vsel %vm1955_vm8, %v1954_v58, %v1951_v56 }
 0x81e   :  { %v1944_v57 = vpop.xlane.xlu1 %1943 }
 0x81f   :  { %v1945_v59 = vsub.f32 %v2197_v55, %v1944_v57 }
 0x821   :  { %v1958_v61 = vsel %vm1957_vm9, %v1956_v60, %v1945_v59 }
 0x822   :  { %v1960_v62 = vsel %vm1959_vm10, %v1958_v61, 0.0 }
 0x823   :  { %1961 = vst [vmem:[%s3160_s9] sm:$0x3] %v1960_v62 }

</bundles_post_ra>
